<compile_context>
chip_gen: v6e
topology: v6e:2x2x1
jax: 0.10.0
libtpu: 0.0.40
codegen_flags: <defaults>
</compile_context>

<pallas_src>
import functools

import numpy as np
import jax
import jax.numpy as jnp
from jax import lax
from jax.experimental import pallas as pl
from jax.experimental.pallas import tpu as pltpu


# ----------------------------- Pallas kernel ------------------------------- #

def _faradays_kernel(*refs, dx, dy, dz, omega, td, d_total, has_target):
    """One (batch, D-tile) grid step.

    refs (theoretical): center, prev_halo, next_halo, out
    refs (data branch): center_pred, center_tgt, prev_pred, prev_tgt,
                        next_pred, next_tgt, out
    center blocks: (1, 12, td, H, W);  halo blocks: (1, 6, 1, H, W)
    out block:     (1, 3, td, H, W)
    """
    if has_target:
        c_p, c_t, p_p, p_t, n_p, n_t, out_ref = refs
    else:
        c_p, p_p, n_p, out_ref = refs
        c_t = p_t = n_t = None

    H = c_p.shape[3]
    W = c_p.shape[4]

    inv2x = 1.0 / (2.0 * dx)   # W axis (lanes)
    inv2y = 1.0 / (2.0 * dy)   # H axis (sublanes)
    inv2z = 1.0 / (2.0 * dz)   # D axis (leading dim)

    def center(ch):
        """Channel `ch` of x (x = target - pred for the data branch), (td,H,W)."""
        v = c_p[0, ch]
        if has_target:
            v = c_t[0, ch] - v
        return v.astype(jnp.float32)

    def halo(pred_ref, tgt_ref, ch):
        """Channel `ch` (< 6) of a 1-plane D halo, shape (1, H, W)."""
        v = pred_ref[0, ch, 0]
        if has_target:
            v = tgt_ref[0, ch, 0] - v
        return v.astype(jnp.float32)[None]

    # Central differences.  H / W boundaries wrap around via pltpu.roll and the
    # D-tile boundary planes come from clamped halos; both only corrupt voxels
    # that sit on the boundary of the full (D, H, W) volume, and those are
    # zeroed by the `interior` mask below (the PyTorch module uses a VALID conv
    # followed by pad(1), i.e. the curl is zero on every boundary voxel).
    def d_dy(f):                                   # d/dy  (H axis)
        return (pltpu.roll(f, H - 1, axis=1) - pltpu.roll(f, 1, axis=1)) * inv2y

    def d_dx(f):                                   # d/dx  (W axis, lanes)
        return (pltpu.roll(f, W - 1, axis=2) - pltpu.roll(f, 1, axis=2)) * inv2x

    def d_dz(ch):                                  # d/dz  (D axis, needs halos)
        f = center(ch)
        fp = halo(p_p, p_t, ch)                    # plane just below the tile
        fn = halo(n_p, n_t, ch)                    # plane just above the tile
        if td > 1:
            upper = jnp.concatenate([f[1:], fn], axis=0)
            lower = jnp.concatenate([fp, f[:td - 1]], axis=0)
        else:
            upper, lower = fn, fp
        return (upper - lower) * inv2z

    # Interior mask for this D tile.
    d0 = pl.program_id(1) * td
    di = lax.broadcasted_iota(jnp.int32, (td, H, W), 0) + d0
    hj = lax.broadcasted_iota(jnp.int32, (H, W), 0)
    wk = lax.broadcasted_iota(jnp.int32, (H, W), 1)
    interior = ((di >= 1) & (di <= d_total - 2) &
                (hj >= 1) & (hj <= H - 2) &
                (wk >= 1) & (wk <= W - 2))

    # Channels: 0..2 E_real, 3..5 E_imag, 6..8 H_real, 9..11 H_imag.
    # Stream one output component at a time (low VMEM / vreg pressure).
    for c in range(3):
        if c == 0:        # cx = dEz/dy - dEy/dz
            cr = d_dy(center(2)) - d_dz(1)
            ci = d_dy(center(5)) - d_dz(4)
        elif c == 1:      # cy = dEx/dz - dEz/dx
            cr = d_dz(0) - d_dx(center(2))
            ci = d_dz(3) - d_dx(center(5))
        else:             # cz = dEy/dx - dEx/dy
            cr = d_dx(center(1)) - d_dy(center(0))
            ci = d_dx(center(4)) - d_dy(center(3))
        cr = jnp.where(interior, cr, 0.0)
        ci = jnp.where(interior, ci, 0.0)
        # faradays_law_hat = (cr + i*ci) - i*omega*(hr + i*hi)
        #                  = (cr + omega*hi) + i*(ci - omega*hr)
        real = cr + omega * center(9 + c)
        imag = ci - omega * center(6 + c)
        out_ref[0, c] = (real * real + imag * imag).astype(out_ref.dtype)


# --------------------------------- wrapper ---------------------------------- #

def _choose_d_tile(D, H, W, has_target, vmem_block_budget=20 * 1024 * 1024):
    """Largest D tile whose double-buffered Pallas blocks fit the VMEM budget."""
    n_in = 2 if has_target else 1
    per_plane = 8 * H * W * (12 * n_in + 3)      # bytes per extra D plane (x2 buffers)
    halo = 8 * H * W * 12 * n_in                 # 2 halo planes x 6 channels (x2 buffers)
    td = (vmem_block_budget - halo) // per_plane
    return int(max(1, min(D, td)))


def faradays_loss(pred, target=None, *, dx=1.0, dy=1.0, dz=1.0,
                  theoretical=True, omega=1.0, d_tile=None):
    """Pallas implementation of FaradaysLoss.forward.

    pred / target: (B, 12, D, H, W) float32 (NCDHW).  Returns (B, 3, D, H, W).
    """
    B, C, D, H, W = pred.shape
    assert C == 12, "FaradaysLoss expects 12 channels (E_re, E_im, H_re, H_im)"
    assert D >= 3 and H >= 3 and W >= 3, "spatial dims must be >= 3"
    has_target = not theoretical
    if has_target:
        assert target is not None and target.shape == pred.shape

    if d_tile is None:
        td = _choose_d_tile(D, H, W, has_target)
    else:
        td = int(max(1, min(D, d_tile)))
    nd = pl.cdiv(D, td)

    # Full 12-channel center tile; channels are sliced inside the kernel.
    center_spec = pl.BlockSpec((1, 12, td, H, W), lambda b, i: (b, 0, i, 0, 0))
    # 1-plane D halos holding only the E channels (channel block of 6 at block
    # index 0).  Clamped at the volume boundary; the interior mask zeroes the
    # curl on those planes anyway so the clamp never affects valid outputs.
    prev_spec = pl.BlockSpec(
        (1, 6, 1, H, W),
        lambda b, i: (b, 0, jnp.maximum(i * td - 1, 0), 0, 0))
    next_spec = pl.BlockSpec(
        (1, 6, 1, H, W),
        lambda b, i: (b, 0, jnp.minimum(i * td + td, D - 1), 0, 0))
    out_spec = pl.BlockSpec((1, 3, td, H, W), lambda b, i: (b, 0, i, 0, 0))

    if has_target:
        in_specs = [center_spec, center_spec, prev_spec, prev_spec,
                    next_spec, next_spec]
        operands = (pred, target, pred, target, pred, target)
    else:
        in_specs = [center_spec, prev_spec, next_spec]
        operands = (pred, pred, pred)

    kernel = functools.partial(_faradays_kernel, dx=dx, dy=dy, dz=dz,
                               omega=omega, td=td, d_total=D,
                               has_target=has_target)

    n_in = 2 if has_target else 1
    bytes_accessed = 4 * H * W * B * (n_in * 12 * D      # center reads
                                      + n_in * 12 * nd   # halo reads
                                      + 3 * D)           # output writes
    flops = (66 + (12 if has_target else 0)) * B * D * H * W

    return pl.pallas_call(
        kernel,
        out_shape=jax.ShapeDtypeStruct((B, 3, D, H, W), jnp.float32),
        grid=(B, nd),
        in_specs=in_specs,
        out_specs=out_spec,
        compiler_params=pltpu.CompilerParams(
            dimension_semantics=("parallel", "parallel"),
            vmem_limit_bytes=32 * 1024 * 1024),
        cost_estimate=pl.CostEstimate(flops=flops, transcendentals=0,
                                      bytes_accessed=bytes_accessed),
    )(*operands)


# ------------------------- Pure-JAX reference ------------------------------ #

def _curl_weight(dx, dy, dz):
    # The deterministic sparse weight the PyTorch module builds in forward().
    w = np.zeros((3, 3, 3, 3, 3), np.float32)  # (out, in, kd, kh, kw)
    w[0, 2, 1, 0, 1] = -1 / (2 * dy)
    w[0, 2, 1, 2, 1] = 1 / (2 * dy)
    w[0, 1, 0, 1, 1] = 1 / (2 * dz)
    w[0, 1, 2, 1, 1] = -1 / (2 * dz)
    w[1, 0, 0, 1, 1] = -1 / (2 * dz)
    w[1, 0, 2, 1, 1] = 1 / (2 * dz)
    w[1, 2, 1, 1, 0] = 1 / (2 * dx)
    w[1, 2, 1, 1, 2] = -1 / (2 * dx)
    w[2, 1, 1, 1, 0] = -1 / (2 * dx)
    w[2, 1, 1, 1, 2] = 1 / (2 * dx)
    w[2, 0, 1, 0, 1] = 1 / (2 * dy)
    w[2, 0, 1, 2, 1] = -1 / (2 * dy)
    return jnp.asarray(w)


def _faradays_reference(pred, target=None, *, dx=1.0, dy=1.0, dz=1.0,
                        theoretical=True, omega=1.0):
    w = _curl_weight(dx, dy, dz)

    def curl(e):
        c = lax.conv_general_dilated(
            e, w, window_strides=(1, 1, 1), padding="VALID",
            dimension_numbers=("NCDHW", "OIDHW", "NCDHW"),
            precision=lax.Precision.HIGHEST)
        return jnp.pad(c, ((0, 0), (0, 0), (1, 1), (1, 1), (1, 1)))

    def law(x):
        cr = curl(x[:, 0:3])
        ci = curl(x[:, 3:6])
        hr = x[:, 6:9]
        hi = x[:, 9:12]
        return cr + omega * hi, ci - omega * hr

    if theoretical:
        r, i = law(pred)
    else:
        rp, ip = law(pred)
        rt, it = law(target)
        r, i = rt - rp, it - ip
    return r * r + i * i


# --------------------------------- main ------------------------------------ #

if __name__ == "__main__":
    key = jax.random.PRNGKey(0)
    k1, k2 = jax.random.split(key)
    # W = 128 keeps the lane dim dense; D = 16 with d_tile = 8 exercises the
    # multi-tile (halo) path of the grid.
    B, C, D, H, W = 2, 12, 16, 8, 128
    pred = jax.random.normal(k1, (B, C, D, H, W), jnp.float32)
    target = jax.random.normal(k2, (B, C, D, H, W), jnp.float32)

    dx, dy, dz, omega = 1.0, 2.0, 0.5, 1.5

    # theoretical branch (module default), explicit D tiling.
    out_t = faradays_loss(pred, dx=dx, dy=dy, dz=dz, theoretical=True,
                          omega=omega, d_tile=8)
    jax.block_until_ready(out_t)
    ref_t = _faradays_reference(pred, dx=dx, dy=dy, dz=dz, theoretical=True,
                                omega=omega)
    np.testing.assert_allclose(np.asarray(out_t), np.asarray(ref_t),
                               rtol=1e-5, atol=1e-5)

    # data branch (theoretical=False), explicit D tiling.
    out_d = faradays_loss(pred, target, dx=dx, dy=dy, dz=dz,
                          theoretical=False, omega=omega, d_tile=8)
    jax.block_until_ready(out_d)
    ref_d = _faradays_reference(pred, target, dx=dx, dy=dy, dz=dz,
                                theoretical=False, omega=omega)
    np.testing.assert_allclose(np.asarray(out_d), np.asarray(ref_d),
                               rtol=1e-5, atol=1e-5)

    # auto tile-size path (single D tile at this small size).
    out_a = faradays_loss(pred, dx=dx, dy=dy, dz=dz, theoretical=True,
                          omega=omega)
    jax.block_until_ready(out_a)
    np.testing.assert_allclose(np.asarray(out_a), np.asarray(ref_t),
                               rtol=1e-5, atol=1e-5)

    print("KERNEL_OK")
</pallas_src>

<mosaic_0001>
module attributes {stable_mosaic.version = 11 : i64} {
  func.func @_faradays_kernel(%arg0: i32, %arg1: i32, %arg2: memref<1x12x8x8x128xf32, #tpu.memory_space<vmem>>, %arg3: memref<1x6x1x8x128xf32, #tpu.memory_space<vmem>>, %arg4: memref<1x6x1x8x128xf32, #tpu.memory_space<vmem>>, %arg5: memref<1x3x8x8x128xf32, #tpu.memory_space<vmem>>) attributes {dimension_semantics = [#tpu.dimension_semantics<parallel>, #tpu.dimension_semantics<parallel>], iteration_bounds = array<i64: 2, 2>, scalar_prefetch = 0 : i64, scratch_operands = 0 : i64, tpu.core_type = #tpu.core_type<tc>, window_params = [{transform_indices = @transform_0, window_bounds = array<i64: 1, 12, 8, 8, 128>}, {transform_indices = @transform_1, window_bounds = array<i64: 1, 6, 1, 8, 128>}, {transform_indices = @transform_2, window_bounds = array<i64: 1, 6, 1, 8, 128>}, {transform_indices = @transform_3, window_bounds = array<i64: 1, 3, 8, 8, 128>}]} {
    %c8_i32 = arith.constant 8 : i32
    %0 = arith.muli %arg1, %c8_i32 : i32
    %1 = tpu.iota {dimensions = array<i32: 0>} : vector<8x8x128xi32>
    %2 = vector.broadcast %0 : i32 to vector<8x8x128xi32>
    %3 = arith.addi %1, %2 : vector<8x8x128xi32>
    %4 = tpu.iota {dimensions = array<i32: 0>} : vector<8x128xi32>
    %5 = tpu.iota {dimensions = array<i32: 1>} : vector<8x128xi32>
    %c1_i32 = arith.constant 1 : i32
    %6 = vector.broadcast %c1_i32 : i32 to vector<8x8x128xi32>
    %7 = arith.cmpi sge, %3, %6 : vector<8x8x128xi32>
    %c14_i32 = arith.constant 14 : i32
    %8 = vector.broadcast %c14_i32 : i32 to vector<8x8x128xi32>
    %9 = arith.cmpi sle, %3, %8 : vector<8x8x128xi32>
    %10 = arith.andi %7, %9 : vector<8x8x128xi1>
    %c1_i32_0 = arith.constant 1 : i32
    %11 = vector.broadcast %c1_i32_0 : i32 to vector<8x128xi32>
    %12 = arith.cmpi sge, %4, %11 : vector<8x128xi32>
    %13 = vector.shape_cast %12 : vector<8x128xi1> to vector<1x8x128xi1>
    %14 = vector.broadcast %13 : vector<1x8x128xi1> to vector<8x8x128xi1>
    %15 = arith.andi %10, %14 : vector<8x8x128xi1>
    %c6_i32 = arith.constant 6 : i32
    %16 = vector.broadcast %c6_i32 : i32 to vector<8x128xi32>
    %17 = arith.cmpi sle, %4, %16 : vector<8x128xi32>
    %18 = vector.shape_cast %17 : vector<8x128xi1> to vector<1x8x128xi1>
    %19 = vector.broadcast %18 : vector<1x8x128xi1> to vector<8x8x128xi1>
    %20 = arith.andi %15, %19 : vector<8x8x128xi1>
    %c1_i32_1 = arith.constant 1 : i32
    %21 = vector.broadcast %c1_i32_1 : i32 to vector<8x128xi32>
    %22 = arith.cmpi sge, %5, %21 : vector<8x128xi32>
    %23 = vector.shape_cast %22 : vector<8x128xi1> to vector<1x8x128xi1>
    %24 = vector.broadcast %23 : vector<1x8x128xi1> to vector<8x8x128xi1>
    %25 = arith.andi %20, %24 : vector<8x8x128xi1>
    %c126_i32 = arith.constant 126 : i32
    %26 = vector.broadcast %c126_i32 : i32 to vector<8x128xi32>
    %27 = arith.cmpi sle, %5, %26 : vector<8x128xi32>
    %28 = vector.shape_cast %27 : vector<8x128xi1> to vector<1x8x128xi1>
    %29 = vector.broadcast %28 : vector<1x8x128xi1> to vector<8x8x128xi1>
    %30 = arith.andi %25, %29 : vector<8x8x128xi1>
    %c0 = arith.constant 0 : index
    %c2 = arith.constant 2 : index
    %c0_2 = arith.constant 0 : index
    %c0_3 = arith.constant 0 : index
    %c0_4 = arith.constant 0 : index
    %31 = vector.load %arg2[%c0, %c2, %c0_2, %c0_3, %c0_4] : memref<1x12x8x8x128xf32, #tpu.memory_space<vmem>>, vector<1x1x8x8x128xf32>
    %32 = vector.shape_cast %31 : vector<1x1x8x8x128xf32> to vector<8x8x128xf32>
    %c7_i32 = arith.constant 7 : i32
    %33 = tpu.dynamic_rotate %32 by %c7_i32 dim 1 : vector<8x8x128xf32>, i32 -> vector<8x8x128xf32>
    %c1_i32_5 = arith.constant 1 : i32
    %34 = tpu.dynamic_rotate %32 by %c1_i32_5 dim 1 : vector<8x8x128xf32>, i32 -> vector<8x8x128xf32>
    %35 = arith.subf %33, %34 : vector<8x8x128xf32>
    %cst = arith.constant 2.500000e-01 : f32
    %36 = vector.broadcast %cst : f32 to vector<8x8x128xf32>
    %37 = arith.mulf %35, %36 : vector<8x8x128xf32>
    %c0_6 = arith.constant 0 : index
    %c1 = arith.constant 1 : index
    %c0_7 = arith.constant 0 : index
    %c0_8 = arith.constant 0 : index
    %c0_9 = arith.constant 0 : index
    %38 = vector.load %arg2[%c0_6, %c1, %c0_7, %c0_8, %c0_9] : memref<1x12x8x8x128xf32, #tpu.memory_space<vmem>>, vector<1x1x8x8x128xf32>
    %39 = vector.shape_cast %38 : vector<1x1x8x8x128xf32> to vector<8x8x128xf32>
    %c0_10 = arith.constant 0 : index
    %c1_11 = arith.constant 1 : index
    %c0_12 = arith.constant 0 : index
    %c0_13 = arith.constant 0 : index
    %c0_14 = arith.constant 0 : index
    %40 = vector.load %arg3[%c0_10, %c1_11, %c0_12, %c0_13, %c0_14] : memref<1x6x1x8x128xf32, #tpu.memory_space<vmem>>, vector<1x1x1x8x128xf32>
    %41 = vector.shape_cast %40 : vector<1x1x1x8x128xf32> to vector<8x128xf32>
    %42 = vector.shape_cast %41 : vector<8x128xf32> to vector<1x8x128xf32>
    %c0_15 = arith.constant 0 : index
    %c1_16 = arith.constant 1 : index
    %c0_17 = arith.constant 0 : index
    %c0_18 = arith.constant 0 : index
    %c0_19 = arith.constant 0 : index
    %43 = vector.load %arg4[%c0_15, %c1_16, %c0_17, %c0_18, %c0_19] : memref<1x6x1x8x128xf32, #tpu.memory_space<vmem>>, vector<1x1x1x8x128xf32>
    %44 = vector.shape_cast %43 : vector<1x1x1x8x128xf32> to vector<8x128xf32>
    %45 = vector.shape_cast %44 : vector<8x128xf32> to vector<1x8x128xf32>
    %46 = vector.extract_strided_slice %39 {offsets = [1, 0, 0], sizes = [7, 8, 128], strides = [1, 1, 1]} : vector<8x8x128xf32> to vector<7x8x128xf32>
    %47 = tpu.concatenate %46, %45 in 0 : vector<7x8x128xf32>, vector<1x8x128xf32> -> vector<8x8x128xf32>
    %48 = vector.extract_strided_slice %39 {offsets = [0, 0, 0], sizes = [7, 8, 128], strides = [1, 1, 1]} : vector<8x8x128xf32> to vector<7x8x128xf32>
    %49 = tpu.concatenate %42, %48 in 0 : vector<1x8x128xf32>, vector<7x8x128xf32> -> vector<8x8x128xf32>
    %50 = arith.subf %47, %49 : vector<8x8x128xf32>
    %cst_20 = arith.constant 1.000000e+00 : f32
    %51 = vector.broadcast %cst_20 : f32 to vector<8x8x128xf32>
    %52 = arith.mulf %50, %51 : vector<8x8x128xf32>
    %53 = arith.subf %37, %52 : vector<8x8x128xf32>
    %c0_21 = arith.constant 0 : index
    %c5 = arith.constant 5 : index
    %c0_22 = arith.constant 0 : index
    %c0_23 = arith.constant 0 : index
    %c0_24 = arith.constant 0 : index
    %54 = vector.load %arg2[%c0_21, %c5, %c0_22, %c0_23, %c0_24] : memref<1x12x8x8x128xf32, #tpu.memory_space<vmem>>, vector<1x1x8x8x128xf32>
    %55 = vector.shape_cast %54 : vector<1x1x8x8x128xf32> to vector<8x8x128xf32>
    %c7_i32_25 = arith.constant 7 : i32
    %56 = tpu.dynamic_rotate %55 by %c7_i32_25 dim 1 : vector<8x8x128xf32>, i32 -> vector<8x8x128xf32>
    %c1_i32_26 = arith.constant 1 : i32
    %57 = tpu.dynamic_rotate %55 by %c1_i32_26 dim 1 : vector<8x8x128xf32>, i32 -> vector<8x8x128xf32>
    %58 = arith.subf %56, %57 : vector<8x8x128xf32>
    %cst_27 = arith.constant 2.500000e-01 : f32
    %59 = vector.broadcast %cst_27 : f32 to vector<8x8x128xf32>
    %60 = arith.mulf %58, %59 : vector<8x8x128xf32>
    %c0_28 = arith.constant 0 : index
    %c4 = arith.constant 4 : index
    %c0_29 = arith.constant 0 : index
    %c0_30 = arith.constant 0 : index
    %c0_31 = arith.constant 0 : index
    %61 = vector.load %arg2[%c0_28, %c4, %c0_29, %c0_30, %c0_31] : memref<1x12x8x8x128xf32, #tpu.memory_space<vmem>>, vector<1x1x8x8x128xf32>
    %62 = vector.shape_cast %61 : vector<1x1x8x8x128xf32> to vector<8x8x128xf32>
    %c0_32 = arith.constant 0 : index
    %c4_33 = arith.constant 4 : index
    %c0_34 = arith.constant 0 : index
    %c0_35 = arith.constant 0 : index
    %c0_36 = arith.constant 0 : index
    %63 = vector.load %arg3[%c0_32, %c4_33, %c0_34, %c0_35, %c0_36] : memref<1x6x1x8x128xf32, #tpu.memory_space<vmem>>, vector<1x1x1x8x128xf32>
    %64 = vector.shape_cast %63 : vector<1x1x1x8x128xf32> to vector<8x128xf32>
    %65 = vector.shape_cast %64 : vector<8x128xf32> to vector<1x8x128xf32>
    %c0_37 = arith.constant 0 : index
    %c4_38 = arith.constant 4 : index
    %c0_39 = arith.constant 0 : index
    %c0_40 = arith.constant 0 : index
    %c0_41 = arith.constant 0 : index
    %66 = vector.load %arg4[%c0_37, %c4_38, %c0_39, %c0_40, %c0_41] : memref<1x6x1x8x128xf32, #tpu.memory_space<vmem>>, vector<1x1x1x8x128xf32>
    %67 = vector.shape_cast %66 : vector<1x1x1x8x128xf32> to vector<8x128xf32>
    %68 = vector.shape_cast %67 : vector<8x128xf32> to vector<1x8x128xf32>
    %69 = vector.extract_strided_slice %62 {offsets = [1, 0, 0], sizes = [7, 8, 128], strides = [1, 1, 1]} : vector<8x8x128xf32> to vector<7x8x128xf32>
    %70 = tpu.concatenate %69, %68 in 0 : vector<7x8x128xf32>, vector<1x8x128xf32> -> vector<8x8x128xf32>
    %71 = vector.extract_strided_slice %62 {offsets = [0, 0, 0], sizes = [7, 8, 128], strides = [1, 1, 1]} : vector<8x8x128xf32> to vector<7x8x128xf32>
    %72 = tpu.concatenate %65, %71 in 0 : vector<1x8x128xf32>, vector<7x8x128xf32> -> vector<8x8x128xf32>
    %73 = arith.subf %70, %72 : vector<8x8x128xf32>
    %cst_42 = arith.constant 1.000000e+00 : f32
    %74 = vector.broadcast %cst_42 : f32 to vector<8x8x128xf32>
    %75 = arith.mulf %73, %74 : vector<8x8x128xf32>
    %76 = arith.subf %60, %75 : vector<8x8x128xf32>
    %cst_43 = arith.constant 0.000000e+00 : f32
    %77 = vector.broadcast %cst_43 : f32 to vector<8x8x128xf32>
    %78 = arith.select %30, %53, %77 : vector<8x8x128xi1>, vector<8x8x128xf32>
    %cst_44 = arith.constant 0.000000e+00 : f32
    %79 = vector.broadcast %cst_44 : f32 to vector<8x8x128xf32>
    %80 = arith.select %30, %76, %79 : vector<8x8x128xi1>, vector<8x8x128xf32>
    %c0_45 = arith.constant 0 : index
    %c9 = arith.constant 9 : index
    %c0_46 = arith.constant 0 : index
    %c0_47 = arith.constant 0 : index
    %c0_48 = arith.constant 0 : index
    %81 = vector.load %arg2[%c0_45, %c9, %c0_46, %c0_47, %c0_48] : memref<1x12x8x8x128xf32, #tpu.memory_space<vmem>>, vector<1x1x8x8x128xf32>
    %82 = vector.shape_cast %81 : vector<1x1x8x8x128xf32> to vector<8x8x128xf32>
    %cst_49 = arith.constant 1.500000e+00 : f32
    %83 = vector.broadcast %cst_49 : f32 to vector<8x8x128xf32>
    %84 = arith.mulf %83, %82 : vector<8x8x128xf32>
    %85 = arith.addf %78, %84 : vector<8x8x128xf32>
    %c0_50 = arith.constant 0 : index
    %c6 = arith.constant 6 : index
    %c0_51 = arith.constant 0 : index
    %c0_52 = arith.constant 0 : index
    %c0_53 = arith.constant 0 : index
    %86 = vector.load %arg2[%c0_50, %c6, %c0_51, %c0_52, %c0_53] : memref<1x12x8x8x128xf32, #tpu.memory_space<vmem>>, vector<1x1x8x8x128xf32>
    %87 = vector.shape_cast %86 : vector<1x1x8x8x128xf32> to vector<8x8x128xf32>
    %cst_54 = arith.constant 1.500000e+00 : f32
    %88 = vector.broadcast %cst_54 : f32 to vector<8x8x128xf32>
    %89 = arith.mulf %88, %87 : vector<8x8x128xf32>
    %90 = arith.subf %80, %89 : vector<8x8x128xf32>
    %91 = arith.mulf %85, %85 : vector<8x8x128xf32>
    %92 = arith.mulf %90, %90 : vector<8x8x128xf32>
    %93 = arith.addf %91, %92 : vector<8x8x128xf32>
    %c0_55 = arith.constant 0 : index
    %c0_56 = arith.constant 0 : index
    %c0_57 = arith.constant 0 : index
    %c0_58 = arith.constant 0 : index
    %c0_59 = arith.constant 0 : index
    %94 = vector.load %arg5[%c0_55, %c0_56, %c0_57, %c0_58, %c0_59] : memref<1x3x8x8x128xf32, #tpu.memory_space<vmem>>, vector<1x1x8x8x128xf32>
    %95 = vector.shape_cast %94 : vector<1x1x8x8x128xf32> to vector<8x8x128xf32>
    %96 = vector.shape_cast %93 : vector<8x8x128xf32> to vector<1x1x8x8x128xf32>
    tpu.vector_store %arg5[%c0_55, %c0_56, %c0_57, %c0_58, %c0_59], %96 {strides = array<i32>} : memref<1x3x8x8x128xf32, #tpu.memory_space<vmem>>, vector<1x1x8x8x128xf32>,
    %c0_60 = arith.constant 0 : index
    %c0_61 = arith.constant 0 : index
    %c0_62 = arith.constant 0 : index
    %c0_63 = arith.constant 0 : index
    %c0_64 = arith.constant 0 : index
    %97 = vector.load %arg2[%c0_60, %c0_61, %c0_62, %c0_63, %c0_64] : memref<1x12x8x8x128xf32, #tpu.memory_space<vmem>>, vector<1x1x8x8x128xf32>
    %98 = vector.shape_cast %97 : vector<1x1x8x8x128xf32> to vector<8x8x128xf32>
    %c0_65 = arith.constant 0 : index
    %c0_66 = arith.constant 0 : index
    %c0_67 = arith.constant 0 : index
    %c0_68 = arith.constant 0 : index
    %c0_69 = arith.constant 0 : index
    %99 = vector.load %arg3[%c0_65, %c0_66, %c0_67, %c0_68, %c0_69] : memref<1x6x1x8x128xf32, #tpu.memory_space<vmem>>, vector<1x1x1x8x128xf32>
    %100 = vector.shape_cast %99 : vector<1x1x1x8x128xf32> to vector<8x128xf32>
    %101 = vector.shape_cast %100 : vector<8x128xf32> to vector<1x8x128xf32>
    %c0_70 = arith.constant 0 : index
    %c0_71 = arith.constant 0 : index
    %c0_72 = arith.constant 0 : index
    %c0_73 = arith.constant 0 : index
    %c0_74 = arith.constant 0 : index
    %102 = vector.load %arg4[%c0_70, %c0_71, %c0_72, %c0_73, %c0_74] : memref<1x6x1x8x128xf32, #tpu.memory_space<vmem>>, vector<1x1x1x8x128xf32>
    %103 = vector.shape_cast %102 : vector<1x1x1x8x128xf32> to vector<8x128xf32>
    %104 = vector.shape_cast %103 : vector<8x128xf32> to vector<1x8x128xf32>
    %105 = vector.extract_strided_slice %98 {offsets = [1, 0, 0], sizes = [7, 8, 128], strides = [1, 1, 1]} : vector<8x8x128xf32> to vector<7x8x128xf32>
    %106 = tpu.concatenate %105, %104 in 0 : vector<7x8x128xf32>, vector<1x8x128xf32> -> vector<8x8x128xf32>
    %107 = vector.extract_strided_slice %98 {offsets = [0, 0, 0], sizes = [7, 8, 128], strides = [1, 1, 1]} : vector<8x8x128xf32> to vector<7x8x128xf32>
    %108 = tpu.concatenate %101, %107 in 0 : vector<1x8x128xf32>, vector<7x8x128xf32> -> vector<8x8x128xf32>
    %109 = arith.subf %106, %108 : vector<8x8x128xf32>
    %cst_75 = arith.constant 1.000000e+00 : f32
    %110 = vector.broadcast %cst_75 : f32 to vector<8x8x128xf32>
    %111 = arith.mulf %109, %110 : vector<8x8x128xf32>
    %c0_76 = arith.constant 0 : index
    %c2_77 = arith.constant 2 : index
    %c0_78 = arith.constant 0 : index
    %c0_79 = arith.constant 0 : index
    %c0_80 = arith.constant 0 : index
    %112 = vector.load %arg2[%c0_76, %c2_77, %c0_78, %c0_79, %c0_80] : memref<1x12x8x8x128xf32, #tpu.memory_space<vmem>>, vector<1x1x8x8x128xf32>
    %113 = vector.shape_cast %112 : vector<1x1x8x8x128xf32> to vector<8x8x128xf32>
    %c127_i32 = arith.constant 127 : i32
    %114 = tpu.dynamic_rotate %113 by %c127_i32 dim 2 : vector<8x8x128xf32>, i32 -> vector<8x8x128xf32>
    %c1_i32_81 = arith.constant 1 : i32
    %115 = tpu.dynamic_rotate %113 by %c1_i32_81 dim 2 : vector<8x8x128xf32>, i32 -> vector<8x8x128xf32>
    %116 = arith.subf %114, %115 : vector<8x8x128xf32>
    %cst_82 = arith.constant 5.000000e-01 : f32
    %117 = vector.broadcast %cst_82 : f32 to vector<8x8x128xf32>
    %118 = arith.mulf %116, %117 : vector<8x8x128xf32>
    %119 = arith.subf %111, %118 : vector<8x8x128xf32>
    %c0_83 = arith.constant 0 : index
    %c3 = arith.constant 3 : index
    %c0_84 = arith.constant 0 : index
    %c0_85 = arith.constant 0 : index
    %c0_86 = arith.constant 0 : index
    %120 = vector.load %arg2[%c0_83, %c3, %c0_84, %c0_85, %c0_86] : memref<1x12x8x8x128xf32, #tpu.memory_space<vmem>>, vector<1x1x8x8x128xf32>
    %121 = vector.shape_cast %120 : vector<1x1x8x8x128xf32> to vector<8x8x128xf32>
    %c0_87 = arith.constant 0 : index
    %c3_88 = arith.constant 3 : index
    %c0_89 = arith.constant 0 : index
    %c0_90 = arith.constant 0 : index
    %c0_91 = arith.constant 0 : index
    %122 = vector.load %arg3[%c0_87, %c3_88, %c0_89, %c0_90, %c0_91] : memref<1x6x1x8x128xf32, #tpu.memory_space<vmem>>, vector<1x1x1x8x128xf32>
    %123 = vector.shape_cast %122 : vector<1x1x1x8x128xf32> to vector<8x128xf32>
    %124 = vector.shape_cast %123 : vector<8x128xf32> to vector<1x8x128xf32>
    %c0_92 = arith.constant 0 : index
    %c3_93 = arith.constant 3 : index
    %c0_94 = arith.constant 0 : index
    %c0_95 = arith.constant 0 : index
    %c0_96 = arith.constant 0 : index
    %125 = vector.load %arg4[%c0_92, %c3_93, %c0_94, %c0_95, %c0_96] : memref<1x6x1x8x128xf32, #tpu.memory_space<vmem>>, vector<1x1x1x8x128xf32>
    %126 = vector.shape_cast %125 : vector<1x1x1x8x128xf32> to vector<8x128xf32>
    %127 = vector.shape_cast %126 : vector<8x128xf32> to vector<1x8x128xf32>
    %128 = vector.extract_strided_slice %121 {offsets = [1, 0, 0], sizes = [7, 8, 128], strides = [1, 1, 1]} : vector<8x8x128xf32> to vector<7x8x128xf32>
    %129 = tpu.concatenate %128, %127 in 0 : vector<7x8x128xf32>, vector<1x8x128xf32> -> vector<8x8x128xf32>
    %130 = vector.extract_strided_slice %121 {offsets = [0, 0, 0], sizes = [7, 8, 128], strides = [1, 1, 1]} : vector<8x8x128xf32> to vector<7x8x128xf32>
    %131 = tpu.concatenate %124, %130 in 0 : vector<1x8x128xf32>, vector<7x8x128xf32> -> vector<8x8x128xf32>
    %132 = arith.subf %129, %131 : vector<8x8x128xf32>
    %cst_97 = arith.constant 1.000000e+00 : f32
    %133 = vector.broadcast %cst_97 : f32 to vector<8x8x128xf32>
    %134 = arith.mulf %132, %133 : vector<8x8x128xf32>
    %c0_98 = arith.constant 0 : index
    %c5_99 = arith.constant 5 : index
    %c0_100 = arith.constant 0 : index
    %c0_101 = arith.constant 0 : index
    %c0_102 = arith.constant 0 : index
    %135 = vector.load %arg2[%c0_98, %c5_99, %c0_100, %c0_101, %c0_102] : memref<1x12x8x8x128xf32, #tpu.memory_space<vmem>>, vector<1x1x8x8x128xf32>
    %136 = vector.shape_cast %135 : vector<1x1x8x8x128xf32> to vector<8x8x128xf32>
    %c127_i32_103 = arith.constant 127 : i32
    %137 = tpu.dynamic_rotate %136 by %c127_i32_103 dim 2 : vector<8x8x128xf32>, i32 -> vector<8x8x128xf32>
    %c1_i32_104 = arith.constant 1 : i32
    %138 = tpu.dynamic_rotate %136 by %c1_i32_104 dim 2 : vector<8x8x128xf32>, i32 -> vector<8x8x128xf32>
    %139 = arith.subf %137, %138 : vector<8x8x128xf32>
    %cst_105 = arith.constant 5.000000e-01 : f32
    %140 = vector.broadcast %cst_105 : f32 to vector<8x8x128xf32>
    %141 = arith.mulf %139, %140 : vector<8x8x128xf32>
    %142 = arith.subf %134, %141 : vector<8x8x128xf32>
    %cst_106 = arith.constant 0.000000e+00 : f32
    %143 = vector.broadcast %cst_106 : f32 to vector<8x8x128xf32>
    %144 = arith.select %30, %119, %143 : vector<8x8x128xi1>, vector<8x8x128xf32>
    %cst_107 = arith.constant 0.000000e+00 : f32
    %145 = vector.broadcast %cst_107 : f32 to vector<8x8x128xf32>
    %146 = arith.select %30, %142, %145 : vector<8x8x128xi1>, vector<8x8x128xf32>
    %c0_108 = arith.constant 0 : index
    %c10 = arith.constant 10 : index
    %c0_109 = arith.constant 0 : index
    %c0_110 = arith.constant 0 : index
    %c0_111 = arith.constant 0 : index
    %147 = vector.load %arg2[%c0_108, %c10, %c0_109, %c0_110, %c0_111] : memref<1x12x8x8x128xf32, #tpu.memory_space<vmem>>, vector<1x1x8x8x128xf32>
    %148 = vector.shape_cast %147 : vector<1x1x8x8x128xf32> to vector<8x8x128xf32>
    %cst_112 = arith.constant 1.500000e+00 : f32
    %149 = vector.broadcast %cst_112 : f32 to vector<8x8x128xf32>
    %150 = arith.mulf %149, %148 : vector<8x8x128xf32>
    %151 = arith.addf %144, %150 : vector<8x8x128xf32>
    %c0_113 = arith.constant 0 : index
    %c7 = arith.constant 7 : index
    %c0_114 = arith.constant 0 : index
    %c0_115 = arith.constant 0 : index
    %c0_116 = arith.constant 0 : index
    %152 = vector.load %arg2[%c0_113, %c7, %c0_114, %c0_115, %c0_116] : memref<1x12x8x8x128xf32, #tpu.memory_space<vmem>>, vector<1x1x8x8x128xf32>
    %153 = vector.shape_cast %152 : vector<1x1x8x8x128xf32> to vector<8x8x128xf32>
    %cst_117 = arith.constant 1.500000e+00 : f32
    %154 = vector.broadcast %cst_117 : f32 to vector<8x8x128xf32>
    %155 = arith.mulf %154, %153 : vector<8x8x128xf32>
    %156 = arith.subf %146, %155 : vector<8x8x128xf32>
    %157 = arith.mulf %151, %151 : vector<8x8x128xf32>
    %158 = arith.mulf %156, %156 : vector<8x8x128xf32>
    %159 = arith.addf %157, %158 : vector<8x8x128xf32>
    %c0_118 = arith.constant 0 : index
    %c1_119 = arith.constant 1 : index
    %c0_120 = arith.constant 0 : index
    %c0_121 = arith.constant 0 : index
    %c0_122 = arith.constant 0 : index
    %160 = vector.load %arg5[%c0_118, %c1_119, %c0_120, %c0_121, %c0_122] : memref<1x3x8x8x128xf32, #tpu.memory_space<vmem>>, vector<1x1x8x8x128xf32>
    %161 = vector.shape_cast %160 : vector<1x1x8x8x128xf32> to vector<8x8x128xf32>
    %162 = vector.shape_cast %159 : vector<8x8x128xf32> to vector<1x1x8x8x128xf32>
    tpu.vector_store %arg5[%c0_118, %c1_119, %c0_120, %c0_121, %c0_122], %162 {strides = array<i32>} : memref<1x3x8x8x128xf32, #tpu.memory_space<vmem>>, vector<1x1x8x8x128xf32>,
    %c0_123 = arith.constant 0 : index
    %c1_124 = arith.constant 1 : index
    %c0_125 = arith.constant 0 : index
    %c0_126 = arith.constant 0 : index
    %c0_127 = arith.constant 0 : index
    %163 = vector.load %arg2[%c0_123, %c1_124, %c0_125, %c0_126, %c0_127] : memref<1x12x8x8x128xf32, #tpu.memory_space<vmem>>, vector<1x1x8x8x128xf32>
    %164 = vector.shape_cast %163 : vector<1x1x8x8x128xf32> to vector<8x8x128xf32>
    %c127_i32_128 = arith.constant 127 : i32
    %165 = tpu.dynamic_rotate %164 by %c127_i32_128 dim 2 : vector<8x8x128xf32>, i32 -> vector<8x8x128xf32>
    %c1_i32_129 = arith.constant 1 : i32
    %166 = tpu.dynamic_rotate %164 by %c1_i32_129 dim 2 : vector<8x8x128xf32>, i32 -> vector<8x8x128xf32>
    %167 = arith.subf %165, %166 : vector<8x8x128xf32>
    %cst_130 = arith.constant 5.000000e-01 : f32
    %168 = vector.broadcast %cst_130 : f32 to vector<8x8x128xf32>
    %169 = arith.mulf %167, %168 : vector<8x8x128xf32>
    %c0_131 = arith.constant 0 : index
    %c0_132 = arith.constant 0 : index
    %c0_133 = arith.constant 0 : index
    %c0_134 = arith.constant 0 : index
    %c0_135 = arith.constant 0 : index
    %170 = vector.load %arg2[%c0_131, %c0_132, %c0_133, %c0_134, %c0_135] : memref<1x12x8x8x128xf32, #tpu.memory_space<vmem>>, vector<1x1x8x8x128xf32>
    %171 = vector.shape_cast %170 : vector<1x1x8x8x128xf32> to vector<8x8x128xf32>
    %c7_i32_136 = arith.constant 7 : i32
    %172 = tpu.dynamic_rotate %171 by %c7_i32_136 dim 1 : vector<8x8x128xf32>, i32 -> vector<8x8x128xf32>
    %c1_i32_137 = arith.constant 1 : i32
    %173 = tpu.dynamic_rotate %171 by %c1_i32_137 dim 1 : vector<8x8x128xf32>, i32 -> vector<8x8x128xf32>
    %174 = arith.subf %172, %173 : vector<8x8x128xf32>
    %cst_138 = arith.constant 2.500000e-01 : f32
    %175 = vector.broadcast %cst_138 : f32 to vector<8x8x128xf32>
    %176 = arith.mulf %174, %175 : vector<8x8x128xf32>
    %177 = arith.subf %169, %176 : vector<8x8x128xf32>
    %c0_139 = arith.constant 0 : index
    %c4_140 = arith.constant 4 : index
    %c0_141 = arith.constant 0 : index
    %c0_142 = arith.constant 0 : index
    %c0_143 = arith.constant 0 : index
    %178 = vector.load %arg2[%c0_139, %c4_140, %c0_141, %c0_142, %c0_143] : memref<1x12x8x8x128xf32, #tpu.memory_space<vmem>>, vector<1x1x8x8x128xf32>
    %179 = vector.shape_cast %178 : vector<1x1x8x8x128xf32> to vector<8x8x128xf32>
    %c127_i32_144 = arith.constant 127 : i32
    %180 = tpu.dynamic_rotate %179 by %c127_i32_144 dim 2 : vector<8x8x128xf32>, i32 -> vector<8x8x128xf32>
    %c1_i32_145 = arith.constant 1 : i32
    %181 = tpu.dynamic_rotate %179 by %c1_i32_145 dim 2 : vector<8x8x128xf32>, i32 -> vector<8x8x128xf32>
    %182 = arith.subf %180, %181 : vector<8x8x128xf32>
    %cst_146 = arith.constant 5.000000e-01 : f32
    %183 = vector.broadcast %cst_146 : f32 to vector<8x8x128xf32>
    %184 = arith.mulf %182, %183 : vector<8x8x128xf32>
    %c0_147 = arith.constant 0 : index
    %c3_148 = arith.constant 3 : index
    %c0_149 = arith.constant 0 : index
    %c0_150 = arith.constant 0 : index
    %c0_151 = arith.constant 0 : index
    %185 = vector.load %arg2[%c0_147, %c3_148, %c0_149, %c0_150, %c0_151] : memref<1x12x8x8x128xf32, #tpu.memory_space<vmem>>, vector<1x1x8x8x128xf32>
    %186 = vector.shape_cast %185 : vector<1x1x8x8x128xf32> to vector<8x8x128xf32>
    %c7_i32_152 = arith.constant 7 : i32
    %187 = tpu.dynamic_rotate %186 by %c7_i32_152 dim 1 : vector<8x8x128xf32>, i32 -> vector<8x8x128xf32>
    %c1_i32_153 = arith.constant 1 : i32
    %188 = tpu.dynamic_rotate %186 by %c1_i32_153 dim 1 : vector<8x8x128xf32>, i32 -> vector<8x8x128xf32>
    %189 = arith.subf %187, %188 : vector<8x8x128xf32>
    %cst_154 = arith.constant 2.500000e-01 : f32
    %190 = vector.broadcast %cst_154 : f32 to vector<8x8x128xf32>
    %191 = arith.mulf %189, %190 : vector<8x8x128xf32>
    %192 = arith.subf %184, %191 : vector<8x8x128xf32>
    %cst_155 = arith.constant 0.000000e+00 : f32
    %193 = vector.broadcast %cst_155 : f32 to vector<8x8x128xf32>
    %194 = arith.select %30, %177, %193 : vector<8x8x128xi1>, vector<8x8x128xf32>
    %cst_156 = arith.constant 0.000000e+00 : f32
    %195 = vector.broadcast %cst_156 : f32 to vector<8x8x128xf32>
    %196 = arith.select %30, %192, %195 : vector<8x8x128xi1>, vector<8x8x128xf32>
    %c0_157 = arith.constant 0 : index
    %c11 = arith.constant 11 : index
    %c0_158 = arith.constant 0 : index
    %c0_159 = arith.constant 0 : index
    %c0_160 = arith.constant 0 : index
    %197 = vector.load %arg2[%c0_157, %c11, %c0_158, %c0_159, %c0_160] : memref<1x12x8x8x128xf32, #tpu.memory_space<vmem>>, vector<1x1x8x8x128xf32>
    %198 = vector.shape_cast %197 : vector<1x1x8x8x128xf32> to vector<8x8x128xf32>
    %cst_161 = arith.constant 1.500000e+00 : f32
    %199 = vector.broadcast %cst_161 : f32 to vector<8x8x128xf32>
    %200 = arith.mulf %199, %198 : vector<8x8x128xf32>
    %201 = arith.addf %194, %200 : vector<8x8x128xf32>
    %c0_162 = arith.constant 0 : index
    %c8 = arith.constant 8 : index
    %c0_163 = arith.constant 0 : index
    %c0_164 = arith.constant 0 : index
    %c0_165 = arith.constant 0 : index
    %202 = vector.load %arg2[%c0_162, %c8, %c0_163, %c0_164, %c0_165] : memref<1x12x8x8x128xf32, #tpu.memory_space<vmem>>, vector<1x1x8x8x128xf32>
    %203 = vector.shape_cast %202 : vector<1x1x8x8x128xf32> to vector<8x8x128xf32>
    %cst_166 = arith.constant 1.500000e+00 : f32
    %204 = vector.broadcast %cst_166 : f32 to vector<8x8x128xf32>
    %205 = arith.mulf %204, %203 : vector<8x8x128xf32>
    %206 = arith.subf %196, %205 : vector<8x8x128xf32>
    %207 = arith.mulf %201, %201 : vector<8x8x128xf32>
    %208 = arith.mulf %206, %206 : vector<8x8x128xf32>
    %209 = arith.addf %207, %208 : vector<8x8x128xf32>
    %c0_167 = arith.constant 0 : index
    %c2_168 = arith.constant 2 : index
    %c0_169 = arith.constant 0 : index
    %c0_170 = arith.constant 0 : index
    %c0_171 = arith.constant 0 : index
    %210 = vector.load %arg5[%c0_167, %c2_168, %c0_169, %c0_170, %c0_171] : memref<1x3x8x8x128xf32, #tpu.memory_space<vmem>>, vector<1x1x8x8x128xf32>
    %211 = vector.shape_cast %210 : vector<1x1x8x8x128xf32> to vector<8x8x128xf32>
    %212 = vector.shape_cast %209 : vector<8x8x128xf32> to vector<1x1x8x8x128xf32>
    tpu.vector_store %arg5[%c0_167, %c2_168, %c0_169, %c0_170, %c0_171], %212 {strides = array<i32>} : memref<1x3x8x8x128xf32, #tpu.memory_space<vmem>>, vector<1x1x8x8x128xf32>,
    return
  }
  func.func @transform_0(%arg0: i32, %arg1: i32) -> (i32, i32, i32, i32, i32) {
    %c0_i32 = arith.constant 0 : i32
    %c0_i32_0 = arith.constant 0 : i32
    %c0_i32_1 = arith.constant 0 : i32
    %c0_i32_2 = arith.constant 0 : i32
    return %arg0, %c0_i32, %arg1, %c0_i32_0, %c0_i32_1 : i32, i32, i32, i32, i32
  }
  func.func @transform_1(%arg0: i32, %arg1: i32) -> (i32, i32, i32, i32, i32) {
    %c8_i32 = arith.constant 8 : i32
    %0 = arith.muli %arg1, %c8_i32 : i32
    %c1_i32 = arith.constant 1 : i32
    %1 = arith.subi %0, %c1_i32 : i32
    %c0_i32 = arith.constant 0 : i32
    %2 = arith.maxsi %1, %c0_i32 : i32
    %c0_i32_0 = arith.constant 0 : i32
    %c0_i32_1 = arith.constant 0 : i32
    %c0_i32_2 = arith.constant 0 : i32
    %c0_i32_3 = arith.constant 0 : i32
    return %arg0, %c0_i32_0, %2, %c0_i32_1, %c0_i32_2 : i32, i32, i32, i32, i32
  }
  func.func @transform_2(%arg0: i32, %arg1: i32) -> (i32, i32, i32, i32, i32) {
    %c8_i32 = arith.constant 8 : i32
    %0 = arith.muli %arg1, %c8_i32 : i32
    %c8_i32_0 = arith.constant 8 : i32
    %1 = arith.addi %0, %c8_i32_0 : i32
    %c15_i32 = arith.constant 15 : i32
    %2 = arith.minsi %1, %c15_i32 : i32
    %c0_i32 = arith.constant 0 : i32
    %c0_i32_1 = arith.constant 0 : i32
    %c0_i32_2 = arith.constant 0 : i32
    %c0_i32_3 = arith.constant 0 : i32
    return %arg0, %c0_i32, %2, %c0_i32_1, %c0_i32_2 : i32, i32, i32, i32, i32
  }
  func.func @transform_3(%arg0: i32, %arg1: i32) -> (i32, i32, i32, i32, i32) {
    %c0_i32 = arith.constant 0 : i32
    %c0_i32_0 = arith.constant 0 : i32
    %c0_i32_1 = arith.constant 0 : i32
    %c0_i32_2 = arith.constant 0 : i32
    return %arg0, %c0_i32, %arg1, %c0_i32_0, %c0_i32_1 : i32, i32, i32, i32, i32
  }
}

</mosaic_0001>

<bundles_post_ra>
// kernel: tpu_custom_call.1
= control target key start
LH: loop header
LB: loop body
LE: loop exit
PB: predicated region body
PF: predicated region fallthrough
CT: control target
= control target key end

     0   :  { %s3333_s0 = inlined_call_operand.hbm [shape: f32[2,12,16,8,128], index: 0, kind: input, shape index: {}]   ;;  %s3334_s1 = inlined_call_operand.hbm [shape: f32[2,12,16,8,128], index: 1, kind: input, shape index: {}]   ;;  %s3335_s2 = inlined_call_operand.hbm [shape: f32[2,12,16,8,128], index: 2, kind: input, shape index: {}]   ;;  %s3336_s3 = inlined_call_operand.hbm [shape: f32[2,3,16,8,128], index: 3, kind: output, shape index: {}]  }
   0x1   :  { %3374 = sst [smem:[#allocation46_spill]] %s3333_s0 }
   0x2   :  { %3375 = sst [smem:[#allocation47_spill]] %s3336_s3 }
   0x3   :  { %8 = vsyncpa [#allocation3], 0 }
   0x4   :  { %10 = vsyncpa [#allocation3 + $0x1], 0 }
   0x5   :  { %11 = vsyncpa [#allocation6], 0 }
   0x6   :  { %13 = vsyncpa [#allocation6 + $0x1], 0 }
   0x7   :  { %14 = vsyncpa [#allocation4], 0 }
   0x8   :  { %16 = vsyncpa [#allocation4 + $0x1], 0  ;;  %s1975_s12 = smov 0   ;;  %s1977_s13 = smov 0  }
   0x9   :  { %s1979_s14 = smov 0   ;;  %s1981_s15 = smov 0  }
   0xa   :  { %s1983_s16 = smov 0   ;;  %s1985_s17 = smov 0  }
   0xb   :  { %s1987_s18 = smov 0   ;;  %s1989_s19 = smov 0  }
   0xc   :  { %s1991_s20 = smov 0   ;;  %s1993_s21 = smov 0  }
   0xd   :  { %s1995_s22 = smov 0   ;;  %s1997_s23 = smov 0  }
   0xe   :  { %s1999_s24 = smov 0   ;;  %s2001_s25 = smov 0  }
   0xf LB: > { %3376 = sst [smem:[#allocation18_spill]] %s1887_s13  ;;  %s2046_s26 = sadd.s32 4294967295, %s1935_s25   ;;  %s1935_s25 = sphi %s2001_s25, %s22_s25   ;;  %s1931_s24 = sphi %s1999_s24, %s3476_s24   ;;  %s1927_s23 = sphi %s1997_s23, %s3475_s23   ;;  %s1923_s22 = sphi %s1995_s22, %s3474_s22   ;;  %s1919_s21 = sphi %s1993_s21, %s3486_s21   ;;  %s1915_s20 = sphi %s1991_s20, %s3472_s20   ;;  %s1911_s19 = sphi %s1989_s19, %s3485_s19   ;;  %s1907_s18 = sphi %s1987_s18, %s3484_s18   ;;  %s1903_s17 = sphi %s1985_s17, %s3483_s17   ;;  %s1899_s16 = sphi %s1983_s16, %s3482_s16   ;;  %s1895_s15 = sphi %s1981_s15, %s3481_s15   ;;  %s1891_s14 = sphi %s1979_s14, %s3480_s14   ;;  %s1887_s13 = sphi %s1977_s13, %s3479_s13   ;;  %s1883_s12 = sphi %s1975_s12, %s3478_s12  }
  0x10   : > { %3377 = sst [smem:[#allocation19_spill]] %s1907_s18  ;;  %s31_s28 = sadd.s32 1, %s1927_s23 }
  0x11   : > { %3378 = sst [smem:[#allocation20_spill]] %s1915_s20  ;;  %s34_s29 = sadd.s32 1, %s1931_s24 }
  0x12   : > { %3379 = sst [smem:[#allocation21_spill]] %s1919_s21  ;;  %p32_p0 = scmp.ge.s32.totalorder %s31_s28, 2 }
  0x13   : > { %3380 = sst [smem:[#allocation22_spill]] %s1923_s22  ;;  %s43_s30 = sadd.s32 1, %s1915_s20 }
  0x14   : > { %3381 = sst [smem:[#allocation23_spill]] %s1927_s23  ;;  %p3341_p1 = scmp.ne.s32.totalorder %s1915_s20, %s1911_s19 }
  0x15   : > { %3382 = sst [smem:[#allocation24_spill]] %s1931_s24  ;;  %p51_p2 = scmp.eq.s32.totalorder %s1935_s25, 0 }
  0x16   : > { %s3488_s28 = smov (%p32_p0, %s31_s28), 0  ;;  %s3490_s29 = smov (!%p32_p0, %s34_s29), %s1931_s24 }
  0x17   : > { %3383 = sst [smem:[#allocation25_spill]] %s3488_s28  ;;  %s39_s4 = ssub.s32 %s1927_s23, %s3488_s28 }
  0x18   : > { %p2065_p3 = por %p51_p2, %p3341_p1  ;;  %p36_p4 = scmp.ge.s32.totalorder %s3490_s29, 2 }
  0x19   : > { %p3340_p5 = scmp.ne.s32.totalorder %s1911_s19, %s1907_s18  ;;  %p57_p6 = scmp.eq.s32.totalorder %s2046_s26, 0 }
  0x1a   : > { %s2073_s6 = sshll.u32 %s1927_s23, 3  ;;  %s3492_s29 = smov (%p36_p4, %s3490_s29), 0 }
  0x1b   : > { %3385 = sst [smem:[#allocation26_spill]] %s3492_s29  ;;  %p2082_p7 = por %p57_p6, %p3340_p5 }
  0x1c   : > { %s1420_s8 = sadd.s32 4294967295, %s2073_s6  ;;  %s2089_s9 = ssub.s32 %s1931_s24, %s3492_s29 }
  0x1d   : > { %s3386_s7 = scalar_select %p2082_p7, 1, 0 }
  0x1e   : > { %p68_p8 = scmp.gt.s32.totalorder %s1420_s8, 0  ;;  %s40_s10 = sor.u32 %s39_s4, %s2089_s9 }
  0x1f   : > { %s1421_s11 = sshll.u32 %s3488_s28, 3  ;;  %p41_p9 = scmp.eq.s32.totalorder %s40_s10, 0 }
  0x20   : > { %s1422_s27 = sadd.s32 4294967295, %s1421_s11  ;;  %s3494_s8 = smov (!%p68_p8, %s1420_s8), 0 }
  0x21   : > { %s2096_s23 = scalar_select %p41_p9, %s1915_s20, %s43_s30  }
  0x22   : > { %p72_p10 = scmp.gt.s32.totalorder %s1422_s27, 0  ;;  %s79_s3 = sadd.s32 1, %s1903_s17 }
  0x23   : > { %3387 = sst [smem:[#allocation27_spill]] %s2096_s23  ;;  %p86_p11 = scmp.ne.s32.totalorder %s1903_s17, %s1899_s16 }
  0x24   : > { %p92_p12 = scmp.ne.s32.totalorder %s1899_s16, %s1895_s15  ;;  %s3496_s27 = smov (!%p72_p10, %s1422_s27), 0 }
  0x25   : > { %p2105_p13 = por %p86_p11, %p51_p2  ;;  %s75_s10 = ssub.s32 %s3494_s8, %s3496_s27 }
  0x26   : > { %p2111_p0 = por %p92_p12, %p57_p6  ;;  %s103_s29 = sadd.s32 8, %s2073_s6 }
  0x27   : > { %s76_s28 = sor.u32 %s75_s10, %s2089_s9  ;;  %p104_p4 = scmp.lt.s32.totalorder %s103_s29, 15 }
  0x28   : > { %s3389_s30 = scalar_select %p2111_p0, 1, 0 }
  0x29   : > { %p77_p8 = scmp.eq.s32.totalorder %s76_s28, 0  ;;  %s107_s15 = sadd.s32 8, %s1421_s11 }
  0x2a   : > { %3390 = sst [smem:[#allocation28_spill]] %s3389_s30  ;;  %s3498_s29 = smov (!%p104_p4, %s103_s29), 15 }
  0x2b   : > { %s2121_s23 = scalar_select %p77_p8, %s1903_s17, %s79_s3  }
  0x2c   : > { %p108_p9 = scmp.lt.s32.totalorder %s107_s15, 15  ;;  %s115_s27 = sadd.s32 1, %s1891_s14 }
  0x2d   : > { %3391 = sst [smem:[#allocation29_spill]] %s2121_s23  ;;  %p122_p10 = scmp.ne.s32.totalorder %s1891_s14, %s1887_s13 }
  0x2e   : > { %p128_p11 = scmp.ne.s32.totalorder %s1887_s13, %s1883_s12  ;;  %s3500_s15 = smov (!%p108_p9, %s107_s15), 15 }
  0x2f   : > { %p2130_p12 = por %p122_p10, %p51_p2  ;;  %s111_s11 = ssub.s32 %s3498_s29, %s3500_s15 }
  0x30   : > { %p2136_p5 = por %p128_p11, %p57_p6  ;;  %p154_p4 = scmp.eq.s32.totalorder %s2046_s26, 3 }
  0x31   : > { %s112_s22 = sor.u32 %s111_s11, %s2089_s9  ;;  %s3395_s3 = sadd.s32 4294967294, %s1935_s25  }
  0x32   : > { %s3393_s28 = scalar_select %p2136_p5, 1, 0 }
  0x33   : > { %p160_p8 = scmp.eq.s32.totalorder %s3395_s3, 3  ;;  %p113_p1 = scmp.eq.s32.totalorder %s112_s22, 0 }
  0x34   : > { %3394 = sst [smem:[#allocation30_spill]] %s3393_s28  ;;  %p3396_p0 = scmp.ne.s32.totalorder %s1915_s20, %s1911_s19 }
  0x35   : > { %p3399_p2 = scmp.ne.s32.totalorder %s1911_s19, %s1907_s18  ;;  %p1426_p6 = scmp.ge.s32.totalorder %s1935_s25, 4 }
  0x36   : > { %p2148_p7 = por %p154_p4, %p3396_p0 }
  0x37   : > { %p2155_p9 = por %p160_p8, %p3399_p2 }
  0x38   : > { %s3397_s12 = scalar_select %p2148_p7, 1, 0 }
  0x39   : > { %s3400_s23 = scalar_select %p2155_p9, 1, 0 }
  0x3a   : > { %3398 = sst [smem:[#allocation31_spill]] %s3397_s12  ;;  %176 = sbr.rel (%p1426_p6) target bundleno = 109 (0x6d), region = 16 }
  0x3b   : > { %3401 = sst [smem:[#allocation32_spill]] %s3400_s23 }
  0x3c   : > { %s2160_s21 = scalar_select %p113_p1, %s1891_s14, %s115_s27  }
  0x3e   : > { %3402 = sst [smem:[#allocation33_spill]] %s2160_s21 }
  0x3f   : > { %s180_s22 = sand.u32 1, %s1915_s20   ;;  %s2165_s9 = smul.u32 192, %s1931_s24 }
  0x40   : > { %s1592_s15 = smul.u32 768, %s180_s22  ;;  %s1937_s18 = smov 2048  }
  0x41   : > { %s190_s11 = sadd.s32 %s2165_s9, %s2073_s6  ;;  %1604 = sst [smem:[#allocation10]] (%p2065_p3), %s1937_s18 }
  0x42   : > { %s1428_s27 = sshll.u32 %s190_s11, 7  ;;  %s184_s21 = scalar_lea.vmem [#allocation2], %s1592_s15 }
  0x43   : > { %s1603_s3 = scalar_select %p2065_p3, [#allocation0], [#allocation13] }
  0x44   : > { %s205_s23 = sshll.u32 %s184_s21, 4  ;;  %s1938_s28 = smov 1024   ;;  %s206_s23 = int_to_ptr.vmem [resolvable:$true] %s205_s23 }
  0x45   : > { %s197_s12 = sld [smem:[%s1603_s3]]   ;;  %s1939_s24 = smov 8  }
  0x46   : > { %1605 = sst [smem:[#allocation10 + $0x1]] (%p2065_p3), %s1938_s28  ;;  %s1940_s13 = smov 128  }
  0x47   : > { %1606 = sst [smem:[#allocation10 + $0x2]] (%p2065_p3), %s1939_s24  ;;  %s181_s15 = scalar_lea.sflag [#allocation3], %s180_s22 }
  0x48   : > { %s3403_s0 = sld [smem:[#allocation46_spill]]  ;;  %s1941_s3 = smov 131072  }
  0x49   : > { %1607 = sst [smem:[#allocation10 + $0x3]] (%p2065_p3), %s1940_s13  ;;  %s228_s20 = sand.u32 1, %s1935_s25  }
  0x4a   : > { %1608 = sst [smem:[#allocation10 + $0x4]] (%p2065_p3), %s1940_s13  ;;  %s230_s28 = sand.u32 1, %s1903_s17  }
  0x4b   : > { %1609 = sst [smem:[#allocation10 + $0x5]] (%p2065_p3), %s1939_s24  ;;  %s1429_s18 = sshll.u32 %s197_s12, 26 }
  0x4c   : > { %s1430_s21 = sadd.s32 134217728, %s1429_s18  ;;  %s241_s6 = sadd.s32 %s2165_s9, %s3494_s8 }
  0x4d   : > { %s256_s5 = sand.u32 1, %s1891_s14   ;;  %s1942_s18 = smov [#allocation5]  }
  0x4e   : > { %s192_s11 = scalar_lea.hbm %s3403_s0, %s1428_s27  ;;  %s1594_s27 = smul.u32 48, %s230_s28 }
  0x4f   : > { %1610 = dma.general (%p2065_p3), %s192_s11, 12288, %s206_s23, %s181_s15, %s1941_s3, [#allocation10], %s1430_s21, 0  }
  0x50   : > { %s1433_s0 = sshll.u32 %s241_s6, 7  ;;  %s232_s12 = scalar_lea.vmem [#allocation5], %s1594_s27 }
  0x51   : > { %s243_s24 = scalar_lea.hbm %s3334_s1, %s1433_s0  ;;  %s244_s22 = sshll.u32 %s232_s12, 4  ;;  %s245_s22 = int_to_ptr.vmem [resolvable:$true] %s244_s22 }
  0x52   : > { %s2196_s23 = scalar_lea.sflag [#allocation6], %s228_s20  ;;  %s1769_s11 = scalar_lea.vmem %s245_s22, 768 }
  0x53   : > { %p1770_p1 = scmp.ne.s32.totalorder %s245_s22, %s1769_s11  ;;  %s1773_s21 = sshll.u32 %s1942_s18, 4  ;;  %s1774_s21 = int_to_ptr.vmem [resolvable:$false] %s1773_s21 }
  0x54   : > { %s1775_s8 = scalar_lea.vmem %s1774_s21, 1536  ;;  %p1776_p10 = scmp.lt.s32.totalorder %s245_s22, %s1774_s21 }
  0x55   : > { %p1771_p3 = pnand %p1770_p1, %p2105_p13  ;;  %p1777_p11 = scmp.lt.s32.totalorder %s1775_s8, %s1769_s11 }
  0x57   : > { %p1772_p0 = pneg %p1771_p3  ;;  %p1778_p4 = por %p1777_p11, %p1776_p10 }
  0x59   : > { %p1779_p8 = pnand %p1778_p4, %p1772_p0 }
  0x5b   : > { %1782 = shalt.err (!%p1779_p8)
}
  0x5c   : > { %s1943_s0 = smov 2048   ;;  %s1944_s30 = smov 128  }
  0x5d   : > { %s1945_s15 = smov 8   ;;  %s1596_s3 = smul.u32 48, %s256_s5 }
  0x5e   : > { %1611 = dma.hbm_to_vmem [thread:$0]  (%p2105_p13), %s243_s24, 768, %s245_s22, %s2196_s23, %s1943_s0, %s1944_s30, %s1945_s15  }
  0x5f   : > { %s267_s20 = sadd.s32 %s2165_s9, %s3498_s29  ;;  %s258_s12 = scalar_lea.vmem [#allocation7], %s1596_s3 }
  0x60   : > { %s1435_s28 = sshll.u32 %s267_s20, 7  ;;  %s270_s11 = sshll.u32 %s258_s12, 4  ;;  %s271_s11 = int_to_ptr.vmem [resolvable:$true] %s270_s11 }
  0x61   : > { %s269_s13 = scalar_lea.hbm %s3335_s2, %s1435_s28  ;;  %s1795_s18 = scalar_lea.vmem %s271_s11, 768 }
  0x62   : > { %p1796_p2 = scmp.ne.s32.totalorder %s271_s11, %s1795_s18  ;;  %s1946_s21 = smov [#allocation7]  }
  0x63   : > { %s1799_s8 = sshll.u32 %s1946_s21, 4  ;;  %s1800_s8 = int_to_ptr.vmem [resolvable:$false] %s1799_s8 }
  0x64   : > { %p1797_p6 = pnand %p1796_p2, %p2130_p12  ;;  %s1801_s4 = scalar_lea.vmem %s1800_s8, 1536 }
  0x65   : > { %p1802_p13 = scmp.lt.s32.totalorder %s271_s11, %s1800_s8  ;;  %p1803_p3 = scmp.lt.s32.totalorder %s1801_s4, %s1795_s18 }
  0x66   : > { %p1798_p1 = pneg %p1797_p6 }
  0x67   : > { %p1804_p0 = por %p1803_p3, %p1802_p13 }
  0x69   : > { %p1805_p10 = pnand %p1804_p0, %p1798_p1 }
  0x6b   : > { %1808 = shalt.err (!%p1805_p10)
}
  0x6c   : > { %1612 = dma.hbm_to_vmem [thread:$0]  (%p2130_p12), %s269_s13, 768, %s271_s11, %s2196_s23, %s1943_s0, %s1944_s30, %s1945_s15  }
  0x6d PF: > { %p1436_p11 = scmp.ge.s32.totalorder %s1935_s25, 1  ;;  %p278_p4 = scmp.lt.s32.totalorder %s1935_s25, 5 }
  0x6f   : > { %p279_p8 = pnand %p1436_p11, %p278_p4 }
  0x71   : > { %282 = sbr.rel (%p279_p8) target bundleno = 409 (0x199), region = 32 }
  0x76   : > { %s2216_s29 = sand.u32 1, %s1911_s19   ;;  %p3404_p2 = scmp.ne.s32.totalorder %s3386_s7, 0 }
  0x77   : > { %s1598_s9 = smul.u32 768, %s2216_s29  ;;  %s285_s24 = scalar_lea.sflag [#allocation3], %s2216_s29 }
  0x79   : > { %s2220_s22 = scalar_lea.vmem [#allocation2], %s1598_s9 }
  0x7a   : > { %1866 = dma.done.wait (%p3404_p2), %s285_s24, 12288  }
  0x7b   : > { %1868 = vsyncadd (%p3404_p2), %s285_s24, 4294955008  ;;  %s3405_s10 = sld [smem:[#allocation28_spill]]  ;;  %s293_s5 = sand.u32 1, %s2046_s26  }
  0x7c   : > { %s295_s23 = sand.u32 1, %s1899_s16   ;;  %s294_s30 = scalar_lea.sflag [#allocation6], %s293_s5 }
  0x7d   : > { %s1599_s0 = smul.u32 48, %s295_s23 }
  0x7f   : > { %s2228_s15 = scalar_lea.vmem [#allocation5], %s1599_s0 }
  0x81   : > { %p3406_p12 = scmp.ne.s32.totalorder %s3405_s10, 0 }
  0x83   : > { %1870 = dma.done.wait (%p3406_p12), %s294_s30, 768  }
  0x84   : > { %1872 = vsyncadd (%p3406_p12), %s294_s30, 4294966528  ;;  %s3407_s3 = sld [smem:[#allocation18_spill]] }
  0x8a   : > { %s304_s28 = sand.u32 1, %s3407_s3  }
  0x8b   : > { %s1600_s27 = smul.u32 48, %s304_s28 }
  0x8d   : > { %s2235_s7 = scalar_lea.vmem [#allocation7], %s1600_s27 }
  0x8e   : > { %1874 = dma.done.wait (%p2136_p5), %s294_s30, 768  }
  0x8f   : > { %1876 = vsyncadd (%p2136_p5), %s294_s30, 4294966528  ;;  %s3409_s26 = sld [smem:[#allocation21_spill]]  ;;  %v358_v0 = vlaneseq  ;;  %v2243_v1 = vld [vmem:[%s2220_s22 + $0x90] sm:$0xff]  ;;  %v2246_v2 = vld [vmem:[%s2220_s22 + $0x80] sm:$0xff]  ;;  %s1947_s13 = smov 127  }
  0x90   : > { %698 = vrot.lane.b32.xlu1 %v2243_v1, %s1947_s13  ;;  %694 = vrot.lane.b32.xlu0 %v2246_v2, %s1947_s13  ;;  %v2258_v5 = vld [vmem:[%s2220_s22 + $0x98] sm:$0xff]  ;;  %v2261_v6 = vld [vmem:[%s2220_s22 + $0x88] sm:$0xff]  ;;  %v439_v37 = vrot.slane %v2246_v2, 1  ;;  %v447_v41 = vrot.slane %v2246_v2, 7  ;;  %s1948_s12 = smov 1   ;;  %s1601_s11 = smul.u32 192, %s2216_s29 }
  0x91   : > { %v2263_v7 = vshrl.u32 %v358_v0, 7  ;;  %v2266_v8 = vld [vmem:[%s2220_s22 + $0x148] sm:$0xff]  ;;  %v2268_v9 = vand.u32 127, %v358_v0  ;;  %v440_v10 = vrot.slane %v2261_v6, 1  ;;  %v448_v11 = vrot.slane %v2261_v6, 7  ;;  %v2282_v15 = vld [vmem:[%s2220_s22 + $0xa0] sm:$0xff] }
  0x92   : > { %v510_v12 = vrot.slane %v2266_v8, 1  ;;  %v518_v13 = vrot.slane %v2266_v8, 7  ;;  %v2279_v14 = vld [vmem:[%s2220_s22 + $0xa8] sm:$0xff]  ;;  %v2286_v16 = vld [vmem:[%s2220_s22 + $0x40] sm:$0xff]  ;;  %v2289_v17 = vld [vmem:[%s2220_s22 + $0x50] sm:$0xff]  ;;  %v455_v49 = vsub.f32 %v439_v37, %v447_v41  ;;  %v442_v0 = vrot.slane %v2258_v5, 1 }
  0x93   : > { %vm386_vm3 = vcmp.ge.s32.totalorder %v2263_v7, 1  ;;  %v456_v18 = vsub.f32 %v440_v10, %v448_v11  ;;  %vm397_vm4 = vcmp.le.s32.totalorder %v2263_v7, 6  ;;  %v485_v20 = vsub.f32 %v2289_v17, %v2286_v16  ;;  %v2299_v21 = vld [vmem:[%s2220_s22 + $0xb8] sm:$0xff]  ;;  %v2306_v25 = vld [vmem:[%s2220_s22 + $0xb0] sm:$0xff]  ;;  %v2309_v26 = vld [vmem:[%s2220_s22 + $0x100] sm:$0xff]  ;;  %s2420_s18 = scalar_lea.vmem [#allocation8], %s1601_s11 }
  0x94   : > { %700 = vrot.lane.b32.xlu1 %v2258_v5, %s1947_s13  ;;  %696 = vrot.lane.b32.xlu0 %v2261_v6, %s1947_s13  ;;  %v526_v19 = vsub.f32 %v510_v12, %v518_v13  ;;  %vm408_vm6 = vcmp.ge.s32.totalorder %v2268_v9, 1  ;;  %v2312_v27 = vld [vmem:[%s2220_s22 + $0x110] sm:$0xff]  ;;  %vm419_vm7 = vcmp.le.s32.totalorder %v2268_v9, 126  ;;  %v1475_v30 = vld [vmem:[%s2220_s22 + $0x248] sm:$0xff]  ;;  %v463_v58 = vmul.f32 0.25, %v455_v49  ;;  %s1242_s21 = scalar_lea.sflag [#allocation4], %s2216_s29 }
  0x95   : > { %s1437_s6 = sshll.u32 %s3409_s26, 3  ;;  %v464_v22 = vmul.f32 0.25, %v456_v18  ;;  %v555_v29 = vsub.f32 %v2312_v27, %v2309_v26  ;;  %v2332_v32 = vld [vmem:[%s2220_s22 + $0x140] sm:$0xff]  ;;  %v596_v35 = vmul.f32 1.5, %v1475_v30  ;;  %v1483_v36 = vld [vmem:[%s2220_s22 + $0x188] sm:$0xff]  ;;  %v2391_v62 = vld [vmem:[%s2220_s22 + $0x158] sm:$0xff] }
  0x96   : > { %v2250_v3 = vstv %s1437_s6  ;;  %v534_v23 = vmul.f32 0.25, %v526_v19  ;;  %v2343_v38 = vld [vmem:[%s2220_s22 + $0x48] sm:$0xff]  ;;  %v621_v40 = vmul.f32 1.5, %v1483_v36  ;;  %v509_v42 = vrot.slane %v2332_v32, 1  ;;  %v1472_v46 = vld [vmem:[%s2228_s15 + $0x20] sm:$0xff]  ;;  %v1477_v13 = vld [vmem:[%s2220_s22 + $0x258] sm:$0xff] }
  0x97   : > { %v351_v4 = vadd.s32 1, %v2250_v3  ;;  %v353_v24 = vadd.s32 3, %v2250_v3  ;;  %v493_v28 = vsub.f32 %v464_v22, %v485_v20  ;;  %vm362_vm9 = vcmp.ge.s32.totalorder %v2250_v3, 1  ;;  %v1454_v45 = vld [vmem:[%s2228_s15 + $0x8] sm:$0xff]  ;;  %v1474_v52 = vld [vmem:[%s2220_s22 + $0x240] sm:$0xff] }
  0x98   : > { %704 = vrot.lane.b32.xlu1 %v2279_v14, %s1947_s13  ;;  %702 = vrot.lane.b32.xlu0 %v2282_v15, %s1947_s13  ;;  %vm370_vm10 = vcmp.le.s32.totalorder %v2250_v3, 14  ;;  %v2325_v31 = vadd.s32 2, %v2250_v3  ;;  %v563_v34 = vsub.f32 %v534_v23, %v555_v29  ;;  %v2360_v47 = vadd.s32 5, %v2250_v3  ;;  %v2372_v53 = vld [vmem:[%s2220_s22 + $0x108] sm:$0xff]  ;;  %v1482_v61 = vld [vmem:[%s2220_s22 + $0x180] sm:$0xff] }
  0x99   : > { %vm363_vm0 = vcmp.ge.s32.totalorder %v351_v4, 1  ;;  %vm371_vm1 = vcmp.le.s32.totalorder %v351_v4, 14  ;;  %vm365_vm13 = vcmp.ge.s32.totalorder %v353_v24, 1  ;;  %vm378_vm14 = vmand %vm362_vm9, %vm370_vm10  ;;  %v484_v50 = vsub.f32 %v2343_v38, %v1454_v45  ;;  %v2399_v4 = vld [vmem:[%s2220_s22 + $0x60] sm:$0xff] }
  0x9a   : > { %vm379_vm2 = vmand %vm363_vm0, %vm371_vm1  ;;  %vm373_vm0 = vcmp.le.s32.totalorder %v353_v24, 14  ;;  %v517_v51 = vrot.slane %v2332_v32, 7  ;;  %v2380_v55 = vadd.s32 4, %v2250_v3  ;;  %v554_v60 = vsub.f32 %v2372_v53, %v1472_v46  ;;  %v2410_v18 = vld [vmem:[%s2220_s22 + $0x120] sm:$0xff]  ;;  %v1485_v24 = vld [vmem:[%s2220_s22 + $0x198] sm:$0xff] }
  0x9b   : > { %vm390_vm5 = vmand %vm379_vm2, %vm386_vm3  ;;  %v595_v63 = vmul.f32 1.5, %v1474_v52  ;;  %v492_v10 = vsub.f32 %v463_v58, %v484_v50  ;;  %v512_v12 = vrot.slane %v2391_v62, 1  ;;  %v620_v19 = vmul.f32 1.5, %v1482_v61  ;;  %v1476_v52 = vld [vmem:[%s2220_s22 + $0x250] sm:$0xff] }
  0x9c   : > { %vm401_vm8 = vmand %vm390_vm5, %vm397_vm4  ;;  %708 = vrot.lane.b32.xlu1 %v2299_v21, %s1947_s13  ;;  %706 = vrot.lane.b32.xlu0 %v2306_v25, %s1947_s13  ;;  %vm364_vm5 = vcmp.ge.s32.totalorder %v2325_v31, 1  ;;  %v525_v59 = vsub.f32 %v509_v42, %v517_v51  ;;  %v487_v22 = vsub.f32 %v2399_v4, %v2289_v17  ;;  %v520_v23 = vrot.slane %v2391_v62, 7 }
  0x9d   : > { %vm412_vm11 = vmand %vm401_vm8, %vm408_vm6  ;;  %vm372_vm8 = vcmp.le.s32.totalorder %v2325_v31, 14  ;;  %v557_v29 = vsub.f32 %v2410_v18, %v2312_v27  ;;  %v598_v37 = vmul.f32 1.5, %v1477_v13  ;;  %v441_v41 = vrot.slane %v2243_v1, 1  ;;  %v2492_v13 = vld [vmem:[%s2220_s22 + $0x168] sm:$0xff] }
  0x9e   : > { %vm2336_vm12 = vmand %vm412_vm11, %vm419_vm7  ;;  %vm367_vm11 = vcmp.ge.s32.totalorder %v2360_v47, 1  ;;  %v533_v11 = vmul.f32 0.25, %v525_v59  ;;  %v528_v36 = vsub.f32 %v512_v12, %v520_v23  ;;  %v449_v42 = vrot.slane %v2243_v1, 7 }
  0x9f   : > { %v571_v39 = vsel %vm2336_vm12, %v493_v28, 0.0  ;;  %v579_v43 = vsel %vm2336_vm12, %v563_v34, 0.0  ;;  %vm389_vm15 = vmand %vm378_vm14, %vm386_vm3  ;;  %v597_v12 = vmul.f32 1.5, %v1476_v52  ;;  %v3428_v7 = vmov 0 }
  0xa0   : > { %v604_v44 = vadd.f32 %v596_v35, %v571_v39  ;;  %v629_v48 = vsub.f32 %v579_v43, %v621_v40  ;;  %vm400_vm1 = vmand %vm389_vm15, %vm397_vm4  ;;  %712 = vrot.lane.b32.xlu1 %v2261_v6, %s1948_s12  ;;  %710 = vrot.lane.b32.xlu0 %v2246_v2, %s1948_s12  ;;  %v450_v2 = vrot.slane %v2258_v5, 7  ;;  %v623_v40 = vmul.f32 1.5, %v1485_v24  ;;  %v2449_v43 = vld [vmem:[%s2220_s22 + $0x150] sm:$0xff] }
  0xa1   : > { %vm411_vm2 = vmand %vm400_vm1, %vm408_vm6  ;;  %v511_v50 = vrot.slane %v2449_v43, 1  ;;  %v519_v51 = vrot.slane %v2449_v43, 7 }
  0xa2   : > { %v637_v54 = vmul.f32 %v604_v44, %v604_v44  ;;  %v645_v56 = vmul.f32 %v629_v48, %v629_v48  ;;  %vm2384_vm9 = vmand %vm411_vm2, %vm419_vm7  ;;  %v458_v20 = vsub.f32 %v442_v0, %v450_v2  ;;  %v2452_v44 = vld [vmem:[%s2220_s22 + $0x58] sm:$0xff]  ;;  %v536_v48 = vmul.f32 0.25, %v528_v36 }
  0xa3   : > { %vm381_vm10 = vmand %vm365_vm13, %vm373_vm0  ;;  %v570_v28 = vsel %vm2384_vm9, %v492_v10, 0.0  ;;  %vm375_vm0 = vcmp.le.s32.totalorder %v2360_v47, 14  ;;  %v486_v49 = vsub.f32 %v2452_v44, %v2343_v38  ;;  %v527_v0 = vsub.f32 %v511_v50, %v519_v51 }
  0xa4   : > { %v653_v6 = vadd.f32 %v645_v56, %v637_v54  ;;  %vm392_vm14 = vmand %vm381_vm10, %vm386_vm3  ;;  %716 = vrot.lane.b32.xlu1 %v2258_v5, %s1948_s12  ;;  %714 = vrot.lane.b32.xlu0 %v2243_v1, %s1948_s12  ;;  %v562_v5 = vsub.f32 %v533_v11, %v554_v60  ;;  %v603_v30 = vadd.f32 %v595_v63, %v570_v28  ;;  %v466_v35 = vmul.f32 0.25, %v458_v20  ;;  %v2464_v54 = vld [vmem:[%s2220_s22 + $0x118] sm:$0xff] }
  0xa5   : > { %vm403_vm13 = vmand %vm392_vm14, %vm397_vm4  ;;  %v457_v1 = vsub.f32 %v441_v41, %v449_v42  ;;  %v565_v58 = vsub.f32 %v536_v48, %v557_v29  ;;  %vm366_vm14 = vcmp.ge.s32.totalorder %v2380_v55, 1  ;;  %v556_v2 = vsub.f32 %v2464_v54, %v2372_v53  ;;  %v2503_v29 = vld [vmem:[%s2220_s22 + $0x70] sm:$0xff] }
  0xa6   : > { %661 = vst [vmem:[%s2420_s18 + $0x8] sm:$0xff] %v653_v6  ;;  %vm414_vm15 = vmand %vm403_vm13, %vm408_vm6  ;;  %v578_v39 = vsel %vm2384_vm9, %v562_v5, 0.0  ;;  %v636_v46 = vmul.f32 %v603_v30, %v603_v30  ;;  %v495_v31 = vsub.f32 %v466_v35, %v487_v22  ;;  %v1484_v6 = vld [vmem:[%s2220_s22 + $0x190] sm:$0xff]  ;;  %v535_v23 = vmul.f32 0.25, %v527_v0  ;;  %v2549_v0 = vld [vmem:[%s2220_s22 + $0x128] sm:$0xff] }
  0xa7   : > { %vm2432_vm1 = vmand %vm414_vm15, %vm419_vm7  ;;  %v628_v45 = vsub.f32 %v578_v39, %v620_v19  ;;  %v465_v63 = vmul.f32 0.25, %v457_v1  ;;  %v622_v24 = vmul.f32 1.5, %v1484_v6  ;;  %v444_v47 = vrot.slane %v2279_v14, 1  ;;  %v2513_v39 = vld [vmem:[%s2220_s22 + $0x130] sm:$0xff] }
  0xa8   : > { %vm380_vm2 = vmand %vm364_vm5, %vm372_vm8  ;;  %720 = vrot.lane.b32.xlu1 %v2279_v14, %s1948_s12  ;;  %718 = vrot.lane.b32.xlu0 %v2282_v15, %s1948_s12  ;;  %v573_v59 = vsel %vm2432_vm1, %v495_v31, 0.0  ;;  %v581_v11 = vsel %vm2432_vm1, %v565_v58, 0.0  ;;  %v452_v5 = vrot.slane %v2279_v14, 7  ;;  %v514_v28 = vrot.slane %v2492_v13, 1 }
  0xa9   : > { %vm391_vm5 = vmand %vm380_vm2, %vm386_vm3  ;;  %v644_v56 = vmul.f32 %v628_v45, %v628_v45  ;;  %v606_v60 = vadd.f32 %v598_v37, %v573_v59  ;;  %vm374_vm2 = vcmp.le.s32.totalorder %v2380_v55, 14  ;;  %v631_v19 = vsub.f32 %v581_v11, %v623_v40  ;;  %v1479_v45 = vld [vmem:[%s2220_s22 + $0x268] sm:$0xff] }
  0xaa   : > { %vm402_vm8 = vmand %vm391_vm5, %vm397_vm4  ;;  %v494_v22 = vsub.f32 %v465_v63, %v486_v49  ;;  %v564_v35 = vsub.f32 %v535_v23, %v556_v2  ;;  %v522_v37 = vrot.slane %v2492_v13, 7  ;;  %v460_v41 = vsub.f32 %v444_v47, %v452_v5  ;;  %v1487_v49 = vld [vmem:[%s2220_s22 + $0x1a8] sm:$0xff]  ;;  %v1478_v23 = vld [vmem:[%s2220_s22 + $0x260] sm:$0xff] }
  0xab   : > { %vm413_vm10 = vmand %vm402_vm8, %vm408_vm6  ;;  %v652_v10 = vadd.f32 %v644_v56, %v636_v46  ;;  %v639_v20 = vmul.f32 %v606_v60, %v606_v60  ;;  %v647_v30 = vmul.f32 %v631_v19, %v631_v19  ;;  %v489_v42 = vsub.f32 %v2503_v29, %v2399_v4  ;;  %v2536_v56 = vld [vmem:[%s2220_s22 + $0x160] sm:$0xff]  ;;  %v2546_v55 = vld [vmem:[%s2220_s22 + $0x68] sm:$0xff] }
  0xac   : > { %vm2473_vm13 = vmand %vm413_vm10, %vm419_vm7  ;;  %724 = vrot.lane.b32.xlu1 %v2299_v21, %s1948_s12  ;;  %722 = vrot.lane.b32.xlu0 %v2306_v25, %s1948_s12  ;;  %v530_v48 = vsub.f32 %v514_v28, %v522_v37  ;;  %v559_v1 = vsub.f32 %v2513_v39, %v2410_v18  ;;  %v468_v52 = vmul.f32 0.25, %v460_v41  ;;  %v600_v59 = vmul.f32 1.5, %v1479_v45 }
  0xad   : > { %vm383_vm15 = vmand %vm367_vm11, %vm375_vm0  ;;  %660 = vst [vmem:[%s2420_s18] sm:$0xff] %v652_v10  ;;  %v572_v36 = vsel %vm2473_vm13, %v494_v22, 0.0  ;;  %v655_v46 = vadd.f32 %v647_v30, %v639_v20  ;;  %v580_v31 = vsel %vm2473_vm13, %v564_v35, 0.0  ;;  %v443_v60 = vrot.slane %v2282_v15, 1 }
  0xae   : > { %vm394_vm5 = vmand %vm383_vm15, %vm386_vm3  ;;  %v605_v14 = vadd.f32 %v597_v12, %v572_v36  ;;  %v630_v50 = vsub.f32 %v580_v31, %v622_v24  ;;  %v538_v58 = vmul.f32 0.25, %v530_v48  ;;  %v451_v63 = vrot.slane %v2282_v15, 7  ;;  %v1486_v24 = vld [vmem:[%s2220_s22 + $0x1a0] sm:$0xff]  ;;  %v2587_v31 = vld [vmem:[%s2220_s22 + $0x178] sm:$0xff] }
  0xaf   : > { %vm405_vm8 = vmand %vm394_vm5, %vm397_vm4  ;;  %663 = vst [vmem:[%s2420_s18 + $0x18] sm:$0xff] %v655_v46  ;;  %v497_v6 = vsub.f32 %v468_v52, %v489_v42  ;;  %v625_v10 = vmul.f32 1.5, %v1487_v49  ;;  %v513_v11 = vrot.slane %v2536_v56, 1  ;;  %v488_v20 = vsub.f32 %v2546_v55, %v2452_v44  ;;  %v1455_v46 = vld [vmem:[%s2235_s7 + $0x8] sm:$0xff]  ;;  %v2590_v48 = vld [vmem:[%s2220_s22 + $0x170] sm:$0xff] }
  0xb0   : > { %781 = vrot.lane.b32.xlu1 %v2266_v8, %s1947_s13  ;;  %779 = vrot.lane.b32.xlu0 %v2332_v32, %s1947_s13  ;;  %vm2517_vm11 = vmand %vm405_vm8, %vm408_vm6  ;;  %v638_v51 = vmul.f32 %v605_v14, %v605_v14  ;;  %v646_v2 = vmul.f32 %v630_v50, %v630_v50  ;;  %v567_v12 = vsub.f32 %v538_v58, %v559_v1  ;;  %v521_v22 = vrot.slane %v2536_v56, 7 }
  0xb1   : > { %vm382_vm0 = vmand %vm366_vm14, %vm374_vm2  ;;  %v459_v19 = vsub.f32 %v443_v60, %v451_v63  ;;  %v558_v28 = vsub.f32 %v2549_v0, %v2464_v54  ;;  %v599_v41 = vmul.f32 1.5, %v1478_v23  ;;  %v624_v42 = vmul.f32 1.5, %v1486_v24  ;;  %v1473_v60 = vld [vmem:[%s2235_s7 + $0x20] sm:$0xff] }
  0xb2   : > { %vm393_vm10 = vmand %vm382_vm0, %vm386_vm3  ;;  %v654_v47 = vadd.f32 %v646_v2, %v638_v51  ;;  %v529_v14 = vsub.f32 %v513_v11, %v521_v22  ;;  %v357_v45 = vadd.s32 7, %v2250_v3  ;;  %v446_v51 = vrot.slane %v2299_v21, 1  ;;  %v1489_v22 = vld [vmem:[%s2220_s22 + $0x1b8] sm:$0xff] }
  0xb3   : > { %vm404_vm14 = vmand %vm393_vm10, %vm397_vm4  ;;  %v467_v37 = vmul.f32 0.25, %v459_v19  ;;  %v524_v19 = vrot.slane %v2587_v31, 7  ;;  %v561_v24 = vsub.f32 %v1473_v60, %v2513_v39  ;;  %v627_v36 = vmul.f32 1.5, %v1489_v22 }
  0xb4   : > { %785 = vrot.lane.b32.xlu1 %v2391_v62, %s1947_s13  ;;  %783 = vrot.lane.b32.xlu0 %v2449_v43, %s1947_s13  ;;  %vm2558_vm15 = vmand %vm2517_vm11, %vm419_vm7  ;;  %662 = vst [vmem:[%s2420_s18 + $0x10] sm:$0xff] %v654_v47  ;;  %v537_v50 = vmul.f32 0.25, %v529_v14  ;;  %vm369_vm8 = vcmp.ge.s32.totalorder %v357_v45, 1  ;;  %vm377_vm11 = vcmp.le.s32.totalorder %v357_v45, 14  ;;  %v445_v14 = vrot.slane %v2306_v25, 1 }
  0xb5   : > { %v575_v5 = vsel %vm2558_vm15, %v497_v6, 0.0  ;;  %v583_v30 = vsel %vm2558_vm15, %v567_v12, 0.0  ;;  %vm2575_vm2 = vmand %vm404_vm14, %vm408_vm6  ;;  %v496_v49 = vsub.f32 %v467_v37, %v488_v20  ;;  %v491_v6 = vsub.f32 %v1455_v46, %v2503_v29  ;;  %v1481_v20 = vld [vmem:[%s2220_s22 + $0x278] sm:$0xff] }
  0xb6   : > { %v608_v35 = vadd.f32 %v600_v59, %v575_v5  ;;  %v633_v40 = vsub.f32 %v583_v30, %v625_v10  ;;  %vm2597_vm5 = vmand %vm2575_vm2, %vm419_vm7  ;;  %v454_v59 = vrot.slane %v2299_v21, 7  ;;  %v566_v63 = vsub.f32 %v537_v50, %v558_v28 }
  0xb7   : > { %v574_v2 = vsel %vm2597_vm5, %v496_v49, 0.0  ;;  %vm385_vm0 = vmand %vm369_vm8, %vm377_vm11  ;;  %v516_v10 = vrot.slane %v2587_v31, 1  ;;  %v356_v37 = vadd.s32 6, %v2250_v3  ;;  %v453_v46 = vrot.slane %v2306_v25, 7 }
  0xb8   : > { %789 = vrot.lane.b32.xlu1 %v2492_v13, %s1947_s13  ;;  %787 = vrot.lane.b32.xlu0 %v2536_v56, %s1947_s13  ;;  %v641_v1 = vmul.f32 %v608_v35, %v608_v35  ;;  %v649_v52 = vmul.f32 %v633_v40, %v633_v40  ;;  %v607_v12 = vadd.f32 %v599_v41, %v574_v2  ;;  %vm396_vm10 = vmand %vm385_vm0, %vm386_vm3  ;;  %v582_v23 = vsel %vm2597_vm5, %v566_v63, 0.0  ;;  %v2631_v40 = vld [vmem:[%s2220_s22 + $0x78] sm:$0xff] }
  0xb9   : > { %v462_v21 = vsub.f32 %v446_v51, %v454_v59  ;;  %vm407_vm14 = vmand %vm396_vm10, %vm397_vm4  ;;  %v632_v47 = vsub.f32 %v582_v23, %v624_v42  ;;  %v532_v30 = vsub.f32 %v516_v10, %v524_v19  ;;  %v602_v35 = vmul.f32 1.5, %v1481_v20  ;;  %v1480_v51 = vld [vmem:[%s2220_s22 + $0x270] sm:$0xff] }
  0xba   : > { %v657_v11 = vadd.f32 %v649_v52, %v641_v1  ;;  %v640_v5 = vmul.f32 %v607_v12, %v607_v12  ;;  %vm418_vm2 = vmand %vm407_vm14, %vm408_vm6  ;;  %vm368_vm11 = vcmp.ge.s32.totalorder %v356_v37, 1  ;;  %vm376_vm0 = vcmp.le.s32.totalorder %v356_v37, 14  ;;  %v2647_v52 = vld [vmem:[%s2220_s22 + $0x138] sm:$0xff]  ;;  %v1517_v37 = vld [vmem:[%s2220_s22 + $0x288] sm:$0xff] }
  0xbb   : > { %v470_v28 = vmul.f32 0.25, %v462_v21  ;;  %v648_v41 = vmul.f32 %v632_v47, %v632_v47  ;;  %v540_v45 = vmul.f32 0.25, %v532_v30  ;;  %vm2636_vm8 = vmand %vm418_vm2, %vm419_vm7  ;;  %v461_v25 = vsub.f32 %v445_v14, %v453_v46  ;;  %v2772_v14 = vld [vmem:[%s2220_s22] sm:$0xff] }
  0xbc   : > { %793 = vrot.lane.b32.xlu1 %v2587_v31, %s1947_s13  ;;  %791 = vrot.lane.b32.xlu0 %v2590_v48, %s1947_s13  ;;  %665 = vst [vmem:[%s2420_s18 + $0x28] sm:$0xff] %v657_v11  ;;  %vm384_vm10 = vmand %vm368_vm11, %vm376_vm0  ;;  %v523_v60 = vrot.slane %v2590_v48, 7  ;;  %v601_v12 = vmul.f32 1.5, %v1480_v51  ;;  %v676_v46 = vld [vmem:[%s2228_s15] sm:$0xff] }
  0xbd   : > { %v499_v42 = vsub.f32 %v470_v28, %v491_v6  ;;  %v656_v1 = vadd.f32 %v648_v41, %v640_v5  ;;  %v569_v49 = vsub.f32 %v540_v45, %v561_v24  ;;  %vm395_vm14 = vmand %vm384_vm10, %vm386_vm3  ;;  %v469_v2 = vmul.f32 0.25, %v461_v25  ;;  %3431 = vst [vmem:[#allocation35_spill] sm:$0xff] %v2772_v14  ;;  %v2778_v45 = vld [vmem:[%s2220_s22 + $0x8] sm:$0xff]  ;;  %v1518_v25 = vld [vmem:[%s2220_s22 + $0x290] sm:$0xff] }
  0xbe   : > { %vm406_vm2 = vmand %vm395_vm14, %vm397_vm4  ;;  %v560_v6 = vsub.f32 %v2647_v52, %v2549_v0  ;;  %3433 = vst [vmem:[#allocation37_spill] sm:$0xff] %v2778_v45  ;;  %v2788_v51 = vld [vmem:[%s2220_s22 + $0x18] sm:$0xff] }
  0xbf   : > { %v577_v50 = vsel %vm2636_vm8, %v499_v42, 0.0  ;;  %664 = vst [vmem:[%s2420_s18 + $0x20] sm:$0xff] %v656_v1  ;;  %v585_v63 = vsel %vm2636_vm8, %v569_v49, 0.0  ;;  %vm417_vm3 = vmand %vm406_vm2, %vm408_vm6  ;;  %v2775_v42 = vld [vmem:[%s2220_s22 + $0x10] sm:$0xff]  ;;  %v2784_v1 = vld [vmem:[%s2220_s22 + $0x20] sm:$0xff] }
  0xc0   : > { %797 = vrot.lane.b32.xlu1 %v2266_v8, %s1948_s12  ;;  %795 = vrot.lane.b32.xlu0 %v2332_v32, %s1948_s12  ;;  %v490_v8 = vsub.f32 %v2631_v40, %v2546_v55  ;;  %v515_v32 = vrot.slane %v2590_v48, 1  ;;  %v610_v59 = vadd.f32 %v602_v35, %v577_v50  ;;  %v635_v10 = vsub.f32 %v585_v63, %v627_v36  ;;  %vm2668_vm11 = vmand %vm417_vm3, %vm419_vm7 }
  0xc1   : > { %v3429_v7 = vsel %vm2668_vm11, 4294967295, %v3428_v7  ;;  %3432 = vst [vmem:[#allocation36_spill] sm:$0xff] %v2775_v42  ;;  %3434 = vst [vmem:[#allocation38_spill] sm:$0xff] %v2784_v1 }
  0xc2   : > { %v643_v11 = vmul.f32 %v610_v59, %v610_v59  ;;  %v498_v21 = vsub.f32 %v469_v2, %v490_v8  ;;  %v651_v19 = vmul.f32 %v635_v10, %v635_v10  ;;  %3430 = vst [vmem:[#allocation34_spill] sm:$0xff] %v3429_v7  ;;  %v1516_v8 = vld [vmem:[%s2220_s22 + $0x280] sm:$0xff]  ;;  %3435 = vst [vmem:[#allocation39_spill] sm:$0xff] %v2788_v51  ;;  %v1521_v10 = vld [vmem:[%s2220_s22 + $0x2a8] sm:$0xff] }
  0xc3   : > { %v678_v2 = vsub.f32 %v2778_v45, %v676_v46  ;;  %v1530_v7 = vld [vmem:[%s2220_s22 + $0x1f0] sm:$0xff] }
  0xc4   : > { %801 = vrot.lane.b32.xlu1 %v2391_v62, %s1948_s12  ;;  %799 = vrot.lane.b32.xlu0 %v2449_v43, %s1948_s12  ;;  %v531_v62 = vsub.f32 %v515_v32, %v523_v60  ;;  %v1488_v43 = vld [vmem:[%s2220_s22 + $0x1b0] sm:$0xff]  ;;  %v576_v22 = vsel %vm2668_vm11, %v498_v21, 0.0  ;;  %v659_v24 = vadd.f32 %v651_v19, %v643_v11  ;;  %v1519_v32 = vld [vmem:[%s2220_s22 + $0x298] sm:$0xff]  ;;  %v679_v60 = vsub.f32 %v2775_v42, %v2772_v14 }
  0xc5   : > { %v626_v23 = vmul.f32 1.5, %v1488_v43  ;;  %v609_v5 = vadd.f32 %v601_v12, %v576_v22  ;;  %v2799_v11 = vld [vmem:[%s2220_s22 + $0x30] sm:$0xff]  ;;  %v2803_v12 = vmul.f32 1.5, %v1516_v8  ;;  %v2805_v43 = vmul.f32 1.5, %v1519_v32  ;;  %v1520_v19 = vld [vmem:[%s2220_s22 + $0x2a0] sm:$0xff]  ;;  %v1523_v22 = vld [vmem:[%s2220_s22 + $0x2b8] sm:$0xff] }
  0xc6   : > { %v539_v20 = vmul.f32 0.25, %v531_v62  ;;  %667 = vst [vmem:[%s2420_s18 + $0x38] sm:$0xff] %v659_v24  ;;  %v2801_v62 = vmul.f32 1.5, %v1517_v37  ;;  %v681_v21 = vsub.f32 %v2784_v1, %v2775_v42  ;;  %v2814_v24 = vmul.f32 1.5, %v1518_v25  ;;  %v2868_v25 = vld [vmem:[%s2220_s22 + $0xd8] sm:$0xff] }
  0xc8   : > { %805 = vrot.lane.b32.xlu1 %v2492_v13, %s1948_s12  ;;  %803 = vrot.lane.b32.xlu0 %v2536_v56, %s1948_s12  ;;  %v568_v47 = vsub.f32 %v539_v20, %v560_v6  ;;  %v642_v56 = vmul.f32 %v609_v5, %v609_v5  ;;  %v2811_v20 = vld [vmem:[%s2220_s22 + $0x28] sm:$0xff] }
  0xca   : > { %v584_v9 = vsel %vm2668_vm11, %v568_v47, 0.0  ;;  %v680_v47 = vsub.f32 %v2788_v51, %v2778_v45 }
  0xcb   : > { %v634_v13 = vsub.f32 %v584_v9, %v626_v23  ;;  %v2819_v9 = vld [vmem:[%s2235_s7] sm:$0xff] }
  0xcc   : > { %809 = vrot.lane.b32.xlu1 %v2587_v31, %s1948_s12  ;;  %807 = vrot.lane.b32.xlu0 %v2590_v48, %s1948_s12 }
  0xcd   : > { %v650_v28 = vmul.f32 %v634_v13, %v634_v13  ;;  %v1522_v13 = vld [vmem:[%s2220_s22 + $0x2b0] sm:$0xff] }
  0xce   : > { %v2859_v8 = vmul.f32 1.5, %v1522_v13 }
  0xcf   : > { %v658_v30 = vadd.f32 %v650_v28, %v642_v56  ;;  %v2823_v56 = vld [vmem:[%s2220_s22 + $0x38] sm:$0xff]  ;;  %v2825_v28 = vmul.f32 1.5, %v1521_v10  ;;  %v1526_v10 = vld [vmem:[%s2220_s22 + $0x1d0] sm:$0xff] }
  0xd0   : > { %944 = vrot.lane.b32.xlu1 %v2343_v38, %s1947_s13  ;;  %942 = vrot.lane.b32.xlu0 %v2286_v16, %s1947_s13  ;;  %3440 = vst [vmem:[#allocation44_spill] sm:$0xff] %v2859_v8 }
  0xd1   : > { %666 = vst [vmem:[%s2420_s18 + $0x30] sm:$0xff] %v658_v30  ;;  %v683_v30 = vsub.f32 %v2799_v11, %v2784_v1 }
  0xd4   : > { %948 = vrot.lane.b32.xlu1 %v2452_v44, %s1947_s13  ;;  %946 = vrot.lane.b32.xlu0 %v2289_v17, %s1947_s13 }
  0xd8   : > { %952 = vrot.lane.b32.xlu1 %v2546_v55, %s1947_s13  ;;  %950 = vrot.lane.b32.xlu0 %v2399_v4, %s1947_s13 }
  0xdc   : > { %956 = vrot.lane.b32.xlu1 %v2631_v40, %s1947_s13  ;;  %954 = vrot.lane.b32.xlu0 %v2503_v29, %s1947_s13 }
  0xe0   : > { %960 = vrot.lane.b32.xlu1 %v2343_v38, %s1948_s12  ;;  %958 = vrot.lane.b32.xlu0 %v2286_v16, %s1948_s12 }
  0xe4   : > { %964 = vrot.lane.b32.xlu1 %v2452_v44, %s1948_s12  ;;  %962 = vrot.lane.b32.xlu0 %v2289_v17, %s1948_s12 }
  0xe8   : > { %968 = vrot.lane.b32.xlu1 %v2546_v55, %s1948_s12  ;;  %966 = vrot.lane.b32.xlu0 %v2399_v4, %s1948_s12 }
  0xec   : > { %972 = vrot.lane.b32.xlu1 %v2631_v40, %s1948_s12  ;;  %970 = vrot.lane.b32.xlu0 %v2503_v29, %s1948_s12 }
  0xf0   : > { %1048 = vrot.lane.b32.xlu1 %v2372_v53, %s1947_s13  ;;  %1046 = vrot.lane.b32.xlu0 %v2309_v26, %s1947_s13 }
  0xf4   : > { %1052 = vrot.lane.b32.xlu1 %v2464_v54, %s1947_s13  ;;  %1050 = vrot.lane.b32.xlu0 %v2312_v27, %s1947_s13 }
  0xf8   : > { %1056 = vrot.lane.b32.xlu1 %v2549_v0, %s1947_s13  ;;  %1054 = vrot.lane.b32.xlu0 %v2410_v18, %s1947_s13 }
  0xfc   : > { %1060 = vrot.lane.b32.xlu1 %v2647_v52, %s1947_s13  ;;  %1058 = vrot.lane.b32.xlu0 %v2513_v39, %s1947_s13 }
 0x100   : > { %1064 = vrot.lane.b32.xlu1 %v2372_v53, %s1948_s12  ;;  %1062 = vrot.lane.b32.xlu0 %v2309_v26, %s1948_s12 }
 0x102   : > { %v699_v16 = vpop.permute.xlu1 %698  ;;  %v695_v17 = vpop.permute.xlu0 %694 }
 0x104   : > { %1068 = vrot.lane.b32.xlu1 %v2464_v54, %s1948_s12  ;;  %1066 = vrot.lane.b32.xlu0 %v2312_v27, %s1948_s12 }
 0x106   : > { %v701_v38 = vpop.permute.xlu1 %700  ;;  %v697_v4 = vpop.permute.xlu0 %696 }
 0x108   : > { %1072 = vrot.lane.b32.xlu1 %v2549_v0, %s1948_s12  ;;  %1070 = vrot.lane.b32.xlu0 %v2410_v18, %s1948_s12 }
 0x10a   : > { %v2746_v53 = vpop.permute.xlu1 %704  ;;  %v2748_v26 = vpop.permute.xlu0 %702 }
 0x10c   : > { %1076 = vrot.lane.b32.xlu1 %v2647_v52, %s1948_s12  ;;  %1074 = vrot.lane.b32.xlu0 %v2513_v39, %s1948_s12 }
 0x10e   : > { %v2754_v27 = vpop.permute.xlu1 %708  ;;  %v2756_v44 = vpop.permute.xlu0 %706 }
 0x112   : > { %v713_v54 = vpop.permute.xlu1 %712  ;;  %v711_v18 = vpop.permute.xlu0 %710 }
 0x113   : > { %v727_v40 = vsub.f32 %v697_v4, %v713_v54  ;;  %v726_v41 = vsub.f32 %v695_v17, %v711_v18  ;;  %v2838_v54 = vld [vmem:[%s2220_s22 + $0xc0] sm:$0xff]  ;;  %v2841_v18 = vld [vmem:[%s2220_s22 + $0xd0] sm:$0xff] }
 0x114   : > { %3436 = vst [vmem:[#allocation40_spill] sm:$0xff] %v2838_v54  ;;  %3437 = vst [vmem:[#allocation41_spill] sm:$0xff] %v2841_v18 }
 0x115   : > { %v735_v63 = vmul.f32 0.5, %v727_v40  ;;  %v734_v6 = vmul.f32 0.5, %v726_v41  ;;  %v2844_v40 = vmul.f32 1.5, %v1520_v19  ;;  %v2855_v41 = vmul.f32 1.5, %v1523_v22  ;;  %v2876_v19 = vld [vmem:[%s2220_s22 + $0xf0] sm:$0xff]  ;;  %v1529_v22 = vld [vmem:[%s2220_s22 + $0x1e8] sm:$0xff] }
 0x116   : > { %v717_v29 = vpop.permute.xlu1 %716  ;;  %v715_v55 = vpop.permute.xlu0 %714 }
 0x117   : > { %v729_v49 = vsub.f32 %v701_v38, %v717_v29  ;;  %v728_v50 = vsub.f32 %v699_v16, %v715_v55  ;;  %v1525_v29 = vld [vmem:[%s2220_s22 + $0x1c8] sm:$0xff]  ;;  %v743_v55 = vsub.f32 %v679_v60, %v735_v63  ;;  %v742_v37 = vsub.f32 %v678_v2, %v734_v6  ;;  %3439 = vst [vmem:[#allocation43_spill] sm:$0xff] %v2855_v41 }
 0x118   : > { %v764_v2 = vsub.f32 %v2841_v18, %v2838_v54  ;;  %v2872_v6 = vmul.f32 1.5, %v1525_v29 }
 0x119   : > { %v737_v23 = vmul.f32 0.5, %v729_v49  ;;  %v736_v5 = vmul.f32 0.5, %v728_v50  ;;  %v2864_v49 = vld [vmem:[%s2220_s22 + $0xe0] sm:$0xff]  ;;  %v1527_v50 = vld [vmem:[%s2220_s22 + $0x1d8] sm:$0xff]  ;;  %v836_v29 = vsel %vm2336_vm12, %v743_v55, 0.0 }
 0x11a   : > { %v2758_v0 = vpop.permute.xlu1 %720  ;;  %v2760_v31 = vpop.permute.xlu0 %718  ;;  %v2895_v54 = vmul.f32 1.5, %v1527_v50  ;;  %v2906_v55 = vld [vmem:[%s2235_s7 + $0x18] sm:$0xff]  ;;  %v869_v14 = vadd.f32 %v2801_v62, %v836_v29 }
 0x11b   : > { %v731_v16 = vsub.f32 %v2746_v53, %v2758_v0  ;;  %v730_v17 = vsub.f32 %v2748_v26, %v2760_v31  ;;  %v682_v53 = vsub.f32 %v2811_v20, %v2788_v51  ;;  %v2849_v26 = vld [vmem:[%s2220_s22 + $0xc8] sm:$0xff]  ;;  %v1524_v31 = vld [vmem:[%s2220_s22 + $0x1c0] sm:$0xff]  ;;  %v745_v60 = vsub.f32 %v681_v21, %v737_v23 }
 0x11c   : > { %3438 = vst [vmem:[#allocation42_spill] sm:$0xff] %v2849_v26  ;;  %v2852_v0 = vld [vmem:[%s2228_s15 + $0x18] sm:$0xff]  ;;  %v744_v63 = vsub.f32 %v680_v47, %v736_v5  ;;  %v885_v23 = vmul.f32 1.5, %v1524_v31  ;;  %v1528_v5 = vld [vmem:[%s2220_s22 + $0x1e0] sm:$0xff]  ;;  %v765_v42 = vsub.f32 %v2868_v25, %v2849_v26  ;;  %v2903_v51 = vmul.f32 1.5, %v1529_v22 }
 0x11d   : > { %v739_v13 = vmul.f32 0.5, %v731_v16  ;;  %v738_v32 = vmul.f32 0.5, %v730_v17  ;;  %v763_v21 = vsub.f32 %v2849_v26, %v2852_v0  ;;  %v2886_v47 = vld [vmem:[%s2220_s22 + $0xe8] sm:$0xff]  ;;  %v835_v16 = vsel %vm2384_vm9, %v742_v37, 0.0  ;;  %v1531_v37 = vld [vmem:[%s2220_s22 + $0x1f8] sm:$0xff] }
 0x11e   : > { %v2762_v48 = vpop.permute.xlu1 %724  ;;  %v2764_v39 = vpop.permute.xlu0 %722  ;;  %v766_v17 = vsub.f32 %v2864_v49, %v2841_v18  ;;  %v2899_v0 = vmul.f32 1.5, %v1526_v10  ;;  %3441 = vst [vmem:[#allocation45_spill] sm:$0xff] %v2903_v51  ;;  %v838_v18 = vsel %vm2432_vm1, %v745_v60, 0.0  ;;  %v837_v50 = vsel %vm2473_vm13, %v744_v63, 0.0  ;;  %v2920_v51 = vld [vmem:[%s2220_s22 + $0xf8] sm:$0xff] }
 0x11f   : > { %v2915_v10 = vmul.f32 1.5, %v1528_v5  ;;  %v868_v31 = vadd.f32 %v2803_v12, %v835_v16  ;;  %v747_v22 = vsub.f32 %v683_v30, %v739_v13  ;;  %v746_v45 = vsub.f32 %v682_v53, %v738_v32 }
 0x120   : > { %v770_v26 = vsub.f32 %v2906_v55, %v2876_v19  ;;  %v2927_v5 = vmul.f32 1.5, %v1531_v37  ;;  %v871_v62 = vadd.f32 %v2805_v43, %v838_v18  ;;  %v870_v12 = vadd.f32 %v2814_v24, %v837_v50 }
 0x121   : > { %v733_v30 = vsub.f32 %v2754_v27, %v2762_v48  ;;  %v732_v53 = vsub.f32 %v2756_v44, %v2764_v39  ;;  %v840_v43 = vsel %vm2558_vm15, %v747_v22, 0.0  ;;  %v839_v24 = vsel %vm2597_vm5, %v746_v45, 0.0 }
 0x122   : > { %v2766_v35 = vpop.permute.xlu1 %781  ;;  %v2768_v36 = vpop.permute.xlu0 %779  ;;  %v904_v16 = vmul.f32 %v871_v62, %v871_v62  ;;  %v903_v37 = vmul.f32 %v870_v12, %v870_v12 }
 0x123   : > { %v740_v50 = vmul.f32 0.5, %v732_v53 }
 0x126   : > { %v2790_v52 = vpop.permute.xlu1 %785  ;;  %v2792_v59 = vpop.permute.xlu0 %783 }
 0x12a   : > { %v2833_v38 = vpop.permute.xlu1 %789  ;;  %v2835_v4 = vpop.permute.xlu0 %787 }
 0x12e   : > { %v2879_v46 = vpop.permute.xlu1 %793  ;;  %v2881_v1 = vpop.permute.xlu0 %791 }
 0x132   : > { %v798_v8 = vpop.permute.xlu1 %797  ;;  %v796_v41 = vpop.permute.xlu0 %795 }
 0x133   : > { %v812_v60 = vsub.f32 %v2766_v35, %v798_v8  ;;  %v811_v63 = vsub.f32 %v2768_v36, %v796_v41  ;;  %v769_v35 = vsub.f32 %v2920_v51, %v2886_v47  ;;  %v2937_v36 = vmul.f32 1.5, %v1530_v7 }
 0x134   : > { %v902_v41 = vmul.f32 %v869_v14, %v869_v14  ;;  %v901_v8 = vmul.f32 %v868_v31, %v868_v31  ;;  %v741_v7 = vmul.f32 0.5, %v733_v30 }
 0x135   : > { %v820_v32 = vmul.f32 0.5, %v812_v60  ;;  %v819_v13 = vmul.f32 0.5, %v811_v63  ;;  %v873_v60 = vadd.f32 %v2825_v28, %v840_v43  ;;  %v3443_v28 = vsub.f32 %v2823_v56, %v2811_v20 }
 0x136   : > { %v802_v18 = vpop.permute.xlu1 %801  ;;  %v800_v27 = vpop.permute.xlu0 %799 }
 0x137   : > { %v828_v48 = vsub.f32 %v764_v2, %v820_v32  ;;  %v827_v29 = vsub.f32 %v763_v21, %v819_v13  ;;  %v814_v44 = vsub.f32 %v2790_v52, %v802_v18  ;;  %v813_v39 = vsub.f32 %v2792_v59, %v800_v27 }
 0x138   : > { %v872_v2 = vadd.f32 %v2844_v40, %v839_v24  ;;  %v3442_v32 = vsub.f32 %v2819_v9, %v2799_v11  ;;  %v748_v43 = vsub.f32 %v3443_v28, %v740_v50 }
 0x139   : > { %v844_v14 = vsel %vm2336_vm12, %v828_v48, 0.0  ;;  %v843_v31 = vsel %vm2384_vm9, %v827_v29, 0.0  ;;  %v822_v22 = vmul.f32 0.5, %v814_v44  ;;  %v821_v45 = vmul.f32 0.5, %v813_v39 }
 0x13a   : > { %v894_v52 = vsub.f32 %v844_v14, %v2872_v6  ;;  %v893_v21 = vsub.f32 %v843_v31, %v885_v23  ;;  %v806_v59 = vpop.permute.xlu1 %805  ;;  %v804_v63 = vpop.permute.xlu0 %803  ;;  %v749_v13 = vsub.f32 %v3442_v32, %v741_v7  ;;  %v3444_v29 = vsub.f32 %v2876_v19, %v2864_v49 }
 0x13b   : > { %v830_v62 = vsub.f32 %v766_v17, %v822_v22  ;;  %v829_v12 = vsub.f32 %v765_v42, %v821_v45  ;;  %v816_v30 = vsub.f32 %v2833_v38, %v806_v59  ;;  %v815_v53 = vsub.f32 %v2835_v4, %v804_v63  ;;  %v3447_v59 = vld [vmem:[#allocation45_spill] sm:$0xff] }
 0x13c   : > { %v910_v40 = vmul.f32 %v894_v52, %v894_v52  ;;  %v909_v24 = vmul.f32 %v893_v21, %v893_v21  ;;  %v3445_v39 = vsub.f32 %v2886_v47, %v2868_v25  ;;  %v905_v32 = vmul.f32 %v872_v2, %v872_v2 }
 0x13d   : > { %v846_v6 = vsel %vm2432_vm1, %v830_v62, 0.0  ;;  %v845_v42 = vsel %vm2473_vm13, %v829_v12, 0.0  ;;  %v824_v38 = vmul.f32 0.5, %v816_v30  ;;  %v823_v4 = vmul.f32 0.5, %v815_v53 }
 0x13e   : > { %v918_v23 = vadd.f32 %v910_v40, %v902_v41  ;;  %v917_v17 = vadd.f32 %v909_v24, %v901_v8  ;;  %v896_v9 = vsub.f32 %v846_v6, %v2895_v54  ;;  %v895_v18 = vsub.f32 %v845_v42, %v2899_v0  ;;  %v810_v27 = vpop.permute.xlu1 %809  ;;  %v808_v48 = vpop.permute.xlu0 %807 }
 0x13f   : > { %v832_v44 = vsub.f32 %v3444_v29, %v824_v38  ;;  %v831_v7 = vsub.f32 %v3445_v39, %v823_v4  ;;  %v818_v50 = vsub.f32 %v2879_v46, %v810_v27  ;;  %v817_v14 = vsub.f32 %v2881_v1, %v808_v48 }
 0x140   : > { %v842_v41 = vsel %vm2636_vm8, %v749_v13, 0.0  ;;  %v841_v0 = vsel %vm2668_vm11, %v748_v43, 0.0  ;;  %1533 = vst [vmem:[%s2420_s18 + $0x48] sm:$0xff] %v918_v23  ;;  %1532 = vst [vmem:[%s2420_s18 + $0x40] sm:$0xff] %v917_v17  ;;  %v912_v8 = vmul.f32 %v896_v9, %v896_v9  ;;  %v911_v31 = vmul.f32 %v895_v18, %v895_v18  ;;  %v3449_v43 = vld [vmem:[#allocation44_spill] sm:$0xff] }
 0x141   : > { %v848_v22 = vsel %vm2558_vm15, %v832_v44, 0.0  ;;  %v847_v45 = vsel %vm2597_vm5, %v831_v7, 0.0  ;;  %v826_v46 = vmul.f32 0.5, %v818_v50  ;;  %v825_v1 = vmul.f32 0.5, %v817_v14  ;;  %v3450_v14 = vld [vmem:[#allocation37_spill] sm:$0xff] }
 0x142   : > { %v920_v52 = vadd.f32 %v912_v8, %v904_v16  ;;  %v919_v21 = vadd.f32 %v911_v31, %v903_v37  ;;  %v898_v63 = vsub.f32 %v848_v22, %v3447_v59  ;;  %v897_v62 = vsub.f32 %v847_v45, %v2915_v10  ;;  %v2986_v12 = vpop.permute.xlu1 %944  ;;  %v2988_v30 = vpop.permute.xlu0 %942  ;;  %v3448_v16 = vld [vmem:[#allocation43_spill] sm:$0xff] }
 0x143   : > { %v906_v53 = vmul.f32 %v873_v60, %v873_v60  ;;  %v834_v13 = vsub.f32 %v770_v26, %v826_v46  ;;  %v833_v28 = vsub.f32 %v769_v35, %v825_v1  ;;  %v875_v37 = vadd.f32 %v3448_v16, %v842_v41  ;;  %v3451_v8 = vld [vmem:[#allocation35_spill] sm:$0xff] }
 0x144   : > { %v874_v40 = vadd.f32 %v3449_v43, %v841_v0  ;;  %1535 = vst [vmem:[%s2420_s18 + $0x58] sm:$0xff] %v920_v52  ;;  %1534 = vst [vmem:[%s2420_s18 + $0x50] sm:$0xff] %v919_v21  ;;  %v914_v10 = vmul.f32 %v898_v63, %v898_v63  ;;  %v913_v24 = vmul.f32 %v897_v62, %v897_v62  ;;  %v999_v41 = vrot.slane %v3450_v14, 1  ;;  %v3452_v45 = vld [vmem:[#allocation39_spill] sm:$0xff]  ;;  %v3453_v52 = vld [vmem:[#allocation36_spill] sm:$0xff] }
 0x145   : > { %v850_v60 = vsel %vm2636_vm8, %v834_v13, 0.0  ;;  %v849_v26 = vsel %vm2668_vm11, %v833_v28, 0.0  ;;  %v908_v4 = vmul.f32 %v875_v37, %v875_v37  ;;  %v1007_v0 = vrot.slane %v3450_v14, 7  ;;  %v1565_v43 = vld [vmem:[%s2220_s22 + $0x2c8] sm:$0xff] }
 0x146   : > { %v922_v55 = vadd.f32 %v914_v10, %v906_v53  ;;  %v921_v2 = vadd.f32 %v913_v24, %v905_v32  ;;  %v900_v35 = vsub.f32 %v850_v60, %v2927_v5  ;;  %v899_v6 = vsub.f32 %v849_v26, %v2937_v36  ;;  %v3006_v42 = vpop.permute.xlu1 %948  ;;  %v3008_v38 = vpop.permute.xlu0 %946  ;;  %v3454_v53 = vld [vmem:[#allocation38_spill] sm:$0xff] }
 0x147   : > { %v907_v23 = vmul.f32 %v874_v40, %v874_v40  ;;  %v998_v31 = vrot.slane %v3451_v8, 1  ;;  %v1006_v22 = vrot.slane %v3451_v8, 7  ;;  %v1001_v46 = vrot.slane %v3452_v45, 1  ;;  %v1564_v60 = vld [vmem:[%s2220_s22 + $0x2c0] sm:$0xff] }
 0x148   : > { %1537 = vst [vmem:[%s2420_s18 + $0x68] sm:$0xff] %v922_v55  ;;  %1536 = vst [vmem:[%s2420_s18 + $0x60] sm:$0xff] %v921_v2  ;;  %v916_v17 = vmul.f32 %v900_v35, %v900_v35  ;;  %v915_v9 = vmul.f32 %v899_v6, %v899_v6  ;;  %v1009_v1 = vrot.slane %v3452_v45, 7  ;;  %v1000_v21 = vrot.slane %v3453_v52, 1  ;;  %v1567_v2 = vld [vmem:[%s2220_s22 + $0x2d8] sm:$0xff]  ;;  %v1566_v35 = vld [vmem:[%s2220_s22 + $0x2d0] sm:$0xff] }
 0x149   : > { %v1008_v59 = vrot.slane %v3453_v52, 7  ;;  %v1003_v63 = vrot.slane %v2811_v20, 1  ;;  %v1011_v62 = vrot.slane %v2811_v20, 7  ;;  %v1002_v32 = vrot.slane %v3454_v53, 1 }
 0x14a   : > { %v924_v18 = vadd.f32 %v916_v17, %v908_v4  ;;  %v923_v27 = vadd.f32 %v915_v9, %v907_v23  ;;  %v3012_v48 = vpop.permute.xlu1 %952  ;;  %v3014_v29 = vpop.permute.xlu0 %950  ;;  %v1010_v13 = vrot.slane %v3454_v53, 7  ;;  %v1015_v37 = vsub.f32 %v999_v41, %v1007_v0 }
 0x14b   : > { %v1014_v40 = vsub.f32 %v998_v31, %v1006_v22  ;;  %v1017_v10 = vsub.f32 %v1001_v46, %v1009_v1  ;;  %v1016_v24 = vsub.f32 %v1000_v21, %v1008_v59  ;;  %v1019_v26 = vsub.f32 %v1003_v63, %v1011_v62  ;;  %v1569_v22 = vld [vmem:[%s2220_s22 + $0x2e8] sm:$0xff]  ;;  %v1568_v46 = vld [vmem:[%s2220_s22 + $0x2e0] sm:$0xff] }
 0x14c   : > { %1539 = vst [vmem:[%s2420_s18 + $0x78] sm:$0xff] %v924_v18  ;;  %1538 = vst [vmem:[%s2420_s18 + $0x70] sm:$0xff] %v923_v27  ;;  %v1018_v55 = vsub.f32 %v1002_v32, %v1010_v13  ;;  %v1005_v20 = vrot.slane %v2823_v56, 1  ;;  %v1013_v6 = vrot.slane %v2823_v56, 7  ;;  %v1004_v23 = vrot.slane %v2799_v11, 1  ;;  %v3455_v63 = vld [vmem:[#allocation42_spill] sm:$0xff] }
 0x14d   : > { %v1012_v17 = vrot.slane %v2799_v11, 7  ;;  %v3058_v18 = vmul.f32 0.25, %v1015_v37  ;;  %v3060_v27 = vmul.f32 1.5, %v1565_v43  ;;  %v3062_v14 = vmul.f32 0.25, %v1014_v40  ;;  %v1571_v37 = vld [vmem:[%s2220_s22 + $0x2f8] sm:$0xff]  ;;  %v1570_v43 = vld [vmem:[%s2220_s22 + $0x2f0] sm:$0xff] }
 0x14e   : > { %v3018_v5 = vpop.permute.xlu1 %956  ;;  %v3020_v36 = vpop.permute.xlu0 %954  ;;  %v3064_v41 = vmul.f32 1.5, %v1564_v60  ;;  %v3066_v0 = vmul.f32 0.25, %v1017_v10  ;;  %v3068_v56 = vmul.f32 0.25, %v1016_v24  ;;  %v3070_v8 = vmul.f32 1.5, %v1567_v2  ;;  %v3456_v40 = vld [vmem:[#allocation40_spill] sm:$0xff] }
 0x14f   : > { %v3072_v31 = vmul.f32 1.5, %v1566_v35  ;;  %v3074_v11 = vmul.f32 0.25, %v1019_v26  ;;  %v3077_v45 = vmul.f32 0.25, %v1018_v55  ;;  %v1021_v1 = vsub.f32 %v1005_v20, %v1013_v6 }
 0x150   : > { %v1020_v52 = vsub.f32 %v1004_v23, %v1012_v17  ;;  %v1103_v62 = vrot.slane %v3455_v63, 1  ;;  %v1111_v53 = vrot.slane %v3455_v63, 7  ;;  %v1102_v10 = vrot.slane %v3456_v40, 1 }
 0x151   : > { %v1110_v24 = vrot.slane %v3456_v40, 7  ;;  %v3094_v60 = vmul.f32 1.5, %v1569_v22  ;;  %v3096_v26 = vmul.f32 1.5, %v1568_v46  ;;  %v1105_v55 = vrot.slane %v2868_v25, 1  ;;  %v1573_v40 = vld [vmem:[%s2220_s22 + $0x208] sm:$0xff] }
 0x152   : > { %v3022_v44 = vpop.permute.xlu1 %960  ;;  %v3024_v39 = vpop.permute.xlu0 %958  ;;  %v1113_v2 = vrot.slane %v2868_v25, 7  ;;  %v3106_v20 = vmul.f32 0.25, %v1021_v1  ;;  %v3108_v6 = vmul.f32 1.5, %v1571_v37  ;;  %v3110_v23 = vmul.f32 0.25, %v1020_v52 }
 0x153   : > { %v975_v32 = vsub.f32 %v2986_v12, %v3022_v44  ;;  %v974_v13 = vsub.f32 %v2988_v30, %v3024_v39  ;;  %v3457_v44 = vld [vmem:[#allocation41_spill] sm:$0xff]  ;;  %v3112_v17 = vmul.f32 1.5, %v1570_v43  ;;  %v1107_v46 = vrot.slane %v2886_v47, 1 }
 0x154   : > { %v1104_v39 = vrot.slane %v3457_v44, 1  ;;  %v1112_v35 = vrot.slane %v3457_v44, 7  ;;  %3458 = vst [vmem:[#allocation34_spill] sm:$0xff] %v3108_v6  ;;  %v1115_v1 = vrot.slane %v2886_v47, 7  ;;  %v1106_v63 = vrot.slane %v2864_v49, 1  ;;  %v1572_v47 = vld [vmem:[%s2220_s22 + $0x200] sm:$0xff] }
 0x155   : > { %3459 = vst [vmem:[#allocation45_spill] sm:$0xff] %v3112_v17  ;;  %v1114_v52 = vrot.slane %v2864_v49, 7  ;;  %v1121_v44 = vsub.f32 %v1105_v55, %v1113_v2  ;;  %v1109_v49 = vrot.slane %v2920_v51, 1 }
 0x156   : > { %v3026_v7 = vpop.permute.xlu1 %964  ;;  %v3028_v50 = vpop.permute.xlu0 %962  ;;  %v1120_v17 = vsub.f32 %v1104_v39, %v1112_v35  ;;  %v1123_v2 = vsub.f32 %v1107_v46, %v1115_v1  ;;  %v1574_v35 = vld [vmem:[%s2220_s22 + $0x210] sm:$0xff]  ;;  %v1577_v46 = vld [vmem:[%s2220_s22 + $0x228] sm:$0xff]  ;;  %v1576_v1 = vld [vmem:[%s2220_s22 + $0x220] sm:$0xff] }
 0x157   : > { %v977_v12 = vsub.f32 %v3006_v42, %v3026_v7  ;;  %v976_v30 = vsub.f32 %v3008_v38, %v3028_v50  ;;  %v983_v42 = vmul.f32 0.5, %v975_v32  ;;  %v982_v7 = vmul.f32 0.5, %v974_v13 }
 0x158   : > { %v1119_v38 = vsub.f32 %v1103_v62, %v1111_v53  ;;  %v1118_v50 = vsub.f32 %v1102_v10, %v1110_v24  ;;  %v1117_v10 = vrot.slane %v2920_v51, 7  ;;  %v3154_v6 = vmul.f32 0.25, %v1120_v17 }
 0x159   : > { %v985_v37 = vmul.f32 0.5, %v977_v12  ;;  %v984_v43 = vmul.f32 0.5, %v976_v30  ;;  %v1031_v24 = vsub.f32 %v983_v42, %v3058_v18  ;;  %v1030_v55 = vsub.f32 %v982_v7, %v3062_v14  ;;  %v1575_v14 = vld [vmem:[%s2220_s22 + $0x218] sm:$0xff] }
 0x15a   : > { %v3042_v28 = vpop.permute.xlu1 %968  ;;  %v3044_v16 = vpop.permute.xlu0 %966  ;;  %v1122_v12 = vsub.f32 %v1106_v63, %v1114_v52  ;;  %v1126_v39 = vmul.f32 0.25, %v1118_v50  ;;  %v3144_v18 = vmul.f32 1.5, %v1572_v47  ;;  %v1125_v50 = vsub.f32 %v1109_v49, %v1117_v10 }
 0x15b   : > { %v979_v32 = vsub.f32 %v3012_v48, %v3042_v28  ;;  %v978_v62 = vsub.f32 %v3014_v29, %v3044_v16  ;;  %v1108_v48 = vrot.slane %v2876_v19, 1  ;;  %v1116_v28 = vrot.slane %v2876_v19, 7 }
 0x15c   : > { %v3138_v29 = vmul.f32 0.25, %v1119_v38  ;;  %v3140_v16 = vmul.f32 1.5, %v1573_v40  ;;  %v1033_v30 = vsub.f32 %v985_v37, %v3066_v0  ;;  %v1032_v51 = vsub.f32 %v984_v43, %v3068_v56  ;;  %v3461_v58 = vld [vmem:[#allocation45_spill] sm:$0xff] }
 0x15d   : > { %v987_v42 = vmul.f32 0.5, %v979_v32  ;;  %v986_v7 = vmul.f32 0.5, %v978_v62  ;;  %v3152_v40 = vmul.f32 0.25, %v1121_v44  ;;  %v1143_v0 = vsel %vm2336_vm12, %v1031_v24, 0.0 }
 0x15e   : > { %v3052_v4 = vpop.permute.xlu1 %972  ;;  %v3056_v9 = vpop.permute.xlu0 %970  ;;  %v1142_v56 = vsel %vm2384_vm9, %v1030_v55, 0.0  ;;  %v1124_v63 = vsub.f32 %v1108_v48, %v1116_v28  ;;  %v3162_v52 = vmul.f32 1.5, %v1575_v14  ;;  %v3164_v37 = vmul.f32 1.5, %v1574_v35 }
 0x15f   : > { %v3166_v43 = vmul.f32 0.25, %v1123_v2  ;;  %v3168_v17 = vmul.f32 0.25, %v1122_v12  ;;  %v1145_v44 = vsel %vm2432_vm1, %v1033_v30, 0.0  ;;  %v1144_v32 = vsel %vm2473_vm13, %v1032_v51, 0.0  ;;  %v1579_v2 = vld [vmem:[%s2220_s22 + $0x238] sm:$0xff]  ;;  %v1578_v12 = vld [vmem:[%s2220_s22 + $0x230] sm:$0xff] }
 0x160   : > { %v3174_v62 = vmul.f32 1.5, %v1577_v46  ;;  %v3176_v47 = vmul.f32 1.5, %v1576_v1  ;;  %v1176_v49 = vadd.f32 %v3060_v27, %v1143_v0  ;;  %v1175_v10 = vadd.f32 %v3064_v41, %v1142_v56 }
 0x161   : > { %v1035_v24 = vsub.f32 %v987_v42, %v3074_v11  ;;  %v1034_v55 = vsub.f32 %v986_v7, %v3077_v45  ;;  %v3186_v14 = vmul.f32 0.25, %v1125_v50  ;;  %v3188_v35 = vmul.f32 0.25, %v1124_v63 }
 0x162   : > { %v3080_v21 = vpop.permute.xlu1 %1048  ;;  %v3082_v59 = vpop.permute.xlu0 %1046  ;;  %v1178_v27 = vadd.f32 %v3070_v8, %v1145_v44  ;;  %v1177_v41 = vadd.f32 %v3072_v31, %v1144_v32  ;;  %v981_v11 = vsub.f32 %v3018_v5, %v3052_v4  ;;  %v980_v45 = vsub.f32 %v3020_v36, %v3056_v9 }
 0x163   : > { %v3196_v46 = vmul.f32 1.5, %v1579_v2  ;;  %v1208_v1 = vmul.f32 %v1175_v10, %v1175_v10  ;;  %v1147_v0 = vsel %vm2558_vm15, %v1035_v24, 0.0  ;;  %v1146_v8 = vsel %vm2597_vm5, %v1034_v55, 0.0 }
 0x164   : > { %v1211_v50 = vmul.f32 %v1178_v27, %v1178_v27  ;;  %v1210_v63 = vmul.f32 %v1177_v41, %v1177_v41  ;;  %v989_v44 = vmul.f32 0.5, %v981_v11  ;;  %v988_v32 = vmul.f32 0.5, %v980_v45 }
 0x166   : > { %v3114_v25 = vpop.permute.xlu1 %1052  ;;  %v3116_v22 = vpop.permute.xlu0 %1050 }
 0x16a   : > { %v3127_v53 = vpop.permute.xlu1 %1056  ;;  %v3129_v13 = vpop.permute.xlu0 %1054 }
 0x16e   : > { %v3148_v19 = vpop.permute.xlu1 %1060  ;;  %v3150_v38 = vpop.permute.xlu0 %1058 }
 0x172   : > { %v1065_v48 = vpop.permute.xlu1 %1064  ;;  %v1063_v28 = vpop.permute.xlu0 %1062 }
 0x173   : > { %v1079_v30 = vsub.f32 %v3080_v21, %v1065_v48  ;;  %v1078_v51 = vsub.f32 %v3082_v59, %v1063_v28  ;;  %v3198_v21 = vmul.f32 1.5, %v1578_v12  ;;  %v1209_v59 = vmul.f32 %v1176_v49, %v1176_v49 }
 0x174   : > { %v1180_v48 = vadd.f32 %v3094_v60, %v1147_v0  ;;  %v1036_v60 = vsub.f32 %v988_v32, %v3110_v23 }
 0x175   : > { %v1087_v42 = vmul.f32 0.5, %v1079_v30  ;;  %v1086_v7 = vmul.f32 0.5, %v1078_v51  ;;  %v1037_v30 = vsub.f32 %v989_v44, %v3106_v20 }
 0x176   : > { %v1069_v31 = vpop.permute.xlu1 %1068  ;;  %v1067_v56 = vpop.permute.xlu0 %1066 }
 0x177   : > { %v1135_v5 = vsub.f32 %v1087_v42, %v3138_v29  ;;  %v1134_v4 = vsub.f32 %v1086_v7, %v1126_v39  ;;  %v1081_v36 = vsub.f32 %v3114_v25, %v1069_v31  ;;  %v1080_v9 = vsub.f32 %v3116_v22, %v1067_v56 }
 0x178   : > { %v1179_v29 = vadd.f32 %v3096_v26, %v1146_v8  ;;  %v1149_v42 = vsel %vm2636_vm8, %v1037_v30, 0.0  ;;  %v1148_v7 = vsel %vm2668_vm11, %v1036_v60, 0.0  ;;  %v1213_v31 = vmul.f32 %v1180_v48, %v1180_v48 }
 0x179   : > { %v1151_v49 = vsel %vm2336_vm12, %v1135_v5, 0.0  ;;  %v1150_v10 = vsel %vm2384_vm9, %v1134_v4, 0.0  ;;  %v1089_v24 = vmul.f32 0.5, %v1081_v36  ;;  %v1088_v55 = vmul.f32 0.5, %v1080_v9  ;;  %v3460_v4 = vld [vmem:[#allocation34_spill] sm:$0xff] }
 0x17a   : > { %v1201_v25 = vsub.f32 %v1151_v49, %v3140_v16  ;;  %v1200_v22 = vsub.f32 %v1150_v10, %v3144_v18  ;;  %v1073_v39 = vpop.permute.xlu1 %1072  ;;  %v1071_v28 = vpop.permute.xlu0 %1070  ;;  %v1212_v56 = vmul.f32 %v1179_v29, %v1179_v29  ;;  %v1182_v36 = vadd.f32 %v3460_v4, %v1149_v42 }
 0x17b   : > { %v1137_v2 = vsub.f32 %v1089_v24, %v3152_v40  ;;  %v1136_v33 = vsub.f32 %v1088_v55, %v3154_v6  ;;  %v1083_v12 = vsub.f32 %v3127_v53, %v1073_v39  ;;  %v1082_v57 = vsub.f32 %v3129_v13, %v1071_v28 }
 0x17c   : > { %v1217_v51 = vmul.f32 %v1201_v25, %v1201_v25  ;;  %v1216_v26 = vmul.f32 %v1200_v22, %v1200_v22  ;;  %v1181_v9 = vadd.f32 %v3461_v58, %v1148_v7  ;;  %v1215_v49 = vmul.f32 %v1182_v36, %v1182_v36 }
 0x17d   : > { %v1153_v16 = vsel %vm2432_vm1, %v1137_v2, 0.0  ;;  %v1152_v18 = vsel %vm2473_vm13, %v1136_v33, 0.0  ;;  %v1091_v40 = vmul.f32 0.5, %v1083_v12  ;;  %v1090_v6 = vmul.f32 0.5, %v1082_v57 }
 0x17e   : > { %v1225_v27 = vadd.f32 %v1217_v51, %v1209_v59  ;;  %v1224_v53 = vadd.f32 %v1216_v26, %v1208_v1  ;;  %v1203_v13 = vsub.f32 %v1153_v16, %v3162_v52  ;;  %v1202_v20 = vsub.f32 %v1152_v18, %v3164_v37  ;;  %v1077_v41 = vpop.permute.xlu1 %1076  ;;  %v1075_v23 = vpop.permute.xlu0 %1074 }
 0x17f   : > { %v1139_v11 = vsub.f32 %v1091_v40, %v3166_v43  ;;  %v1138_v34 = vsub.f32 %v1090_v6, %v3168_v17  ;;  %v1085_v45 = vsub.f32 %v3148_v19, %v1077_v41  ;;  %v1084_v61 = vsub.f32 %v3150_v38, %v1075_v23 }
 0x180   : > { %1581 = vst [vmem:[%s2420_s18 + $0x88] sm:$0xff] %v1225_v27  ;;  %1580 = vst [vmem:[%s2420_s18 + $0x80] sm:$0xff] %v1224_v53  ;;  %v1219_v52 = vmul.f32 %v1203_v13, %v1203_v13  ;;  %v1218_v37 = vmul.f32 %v1202_v20, %v1202_v20  ;;  %v1214_v10 = vmul.f32 %v1181_v9, %v1181_v9 }
 0x181   : > { %v1155_v43 = vsel %vm2558_vm15, %v1139_v11, 0.0  ;;  %v1154_v19 = vsel %vm2597_vm5, %v1138_v34, 0.0  ;;  %v1093_v17 = vmul.f32 0.5, %v1085_v45  ;;  %v1092_v38 = vmul.f32 0.5, %v1084_v61 }
 0x182   : > { %v1227_v59 = vadd.f32 %v1219_v52, %v1211_v50  ;;  %v1226_v1 = vadd.f32 %v1218_v37, %v1210_v63  ;;  %v1205_v0 = vsub.f32 %v1155_v43, %v3174_v62  ;;  %v1204_v8 = vsub.f32 %v1154_v19, %v3176_v47 }
 0x183   : > { %v1141_v5 = vsub.f32 %v1093_v17, %v3186_v14  ;;  %v1140_v15 = vsub.f32 %v1092_v38, %v3188_v35 }
 0x184   : > { %1583 = vst [vmem:[%s2420_s18 + $0x98] sm:$0xff] %v1227_v59  ;;  %1582 = vst [vmem:[%s2420_s18 + $0x90] sm:$0xff] %v1226_v1  ;;  %v1221_v50 = vmul.f32 %v1205_v0, %v1205_v0  ;;  %v1220_v63 = vmul.f32 %v1204_v8, %v1204_v8 }
 0x185   : > { %v1157_v62 = vsel %vm2636_vm8, %v1141_v5, 0.0  ;;  %v1156_v47 = vsel %vm2668_vm11, %v1140_v15, 0.0 }
 0x186   : > { %v1229_v14 = vadd.f32 %v1221_v50, %v1213_v31  ;;  %v1228_v35 = vadd.f32 %v1220_v63, %v1212_v56  ;;  %v1207_v44 = vsub.f32 %v1157_v62, %v3196_v46  ;;  %v1206_v32 = vsub.f32 %v1156_v47, %v3198_v21 }
 0x188   : > { %1585 = vst [vmem:[%s2420_s18 + $0xa8] sm:$0xff] %v1229_v14  ;;  %1584 = vst [vmem:[%s2420_s18 + $0xa0] sm:$0xff] %v1228_v35  ;;  %v1223_v24 = vmul.f32 %v1207_v44, %v1207_v44  ;;  %v1222_v55 = vmul.f32 %v1206_v32, %v1206_v32 }
 0x18a   : > { %v1231_v48 = vadd.f32 %v1223_v24, %v1215_v49  ;;  %v1230_v3 = vadd.f32 %v1222_v55, %v1214_v10 }
 0x18c   : > { %1587 = vst [vmem:[%s2420_s18 + $0xb8] sm:$0xff] %v1231_v48  ;;  %1586 = vst [vmem:[%s2420_s18 + $0xb0] sm:$0xff] %v1230_v3 }
 0x18d   : > { %s3462_s8 = sld [smem:[#allocation22_spill]]  ;;  %s1267_s24 = sshll.u32 %s2420_s18, 4  ;;  %s1268_s24 = int_to_ptr.vmem [resolvable:$true] %s1267_s24 }
 0x18e   : > { %s1949_s10 = smov 1024   ;;  %s3464_s0 = sld [smem:[#allocation47_spill]] }
 0x18f   : > { %1616 = sst [smem:[#allocation12]] (%p2148_p7), %s1949_s10  ;;  %s1950_s15 = smov 2048  }
 0x190   : > { %1617 = sst [smem:[#allocation12 + $0x1]] (%p2148_p7), %s1950_s15  ;;  %s1951_s3 = smov 8  }
 0x191   : > { %1618 = sst [smem:[#allocation12 + $0x2]] (%p2148_p7), %s1951_s3  ;;  %s1952_s20 = smov 128  }
 0x192   : > { %1619 = sst [smem:[#allocation12 + $0x3]] (%p2148_p7), %s1952_s20  ;;  %s1953_s28 = smov 131072  }
 0x193   : > { %s1602_s9 = smul.u32 48, %s3462_s8  ;;  %1620 = sst [smem:[#allocation12 + $0x4]] (%p2148_p7), %s1952_s20 }
 0x194   : > { %1621 = sst [smem:[#allocation12 + $0x5]] (%p2148_p7), %s1951_s3  ;;  %s1954_s27 = smov 0  }
 0x195   : > { %s1254_s22 = sadd.s32 %s1602_s9, %s1437_s6 }
 0x196   : > { %s1589_s5 = sshll.u32 %s1254_s22, 7 }
 0x197   : > { %s1256_s30 = scalar_lea.hbm %s3464_s0, %s1589_s5 }
 0x198   : > { %1622 = dma.general (%p2148_p7), %s1268_s24, 3072, %s1256_s30, %s1242_s21, %s1953_s28, [#allocation12], %s1954_s27, 0  }
 0x199 PF: > { %s3465_s7 = sld [smem:[#allocation19_spill]]  ;;  %p1628_p5 = scmp.ge.s32.totalorder %s1935_s25, 2 }
 0x19b   : > { %p1625_p6 = pnand %p1628_p5, %p2155_p9 }
 0x19d   : > { %p1626_p1 = pneg %p1625_p6 }
 0x19f   : > { %s1295_s6 = sand.u32 1, %s3465_s7  }
 0x1a0   : > { %s1296_s13 = scalar_lea.sflag [#allocation4], %s1295_s6 }
 0x1a1   : > { %1878 = dma.done.wait (%p1626_p1), %s1296_s13, 3072  }
 0x1a2   : > { %1880 = vsyncadd (%p1626_p1), %s1296_s13, 4294964224  ;;  %s22_s25 = sadd.s32 1, %s1935_s25   ;;  %s3468_s11 = sld [smem:[#allocation18_spill]] }
 0x1a3   : > { %p3286_p13 = scmp.ge.s32.totalorder %s22_s25, 6   ;;  %s3469_s18 = sld [smem:[#allocation33_spill]] }
 0x1a4   : > { %s3470_s21 = sld [smem:[#allocation29_spill]]  ;;  %s3479_s13 = smov %s1891_s14 }
 0x1a5   : > { %s3471_s8 = sld [smem:[#allocation20_spill]]  ;;  %s3481_s15 = smov %s1899_s16 }
 0x1a6   : > { %s3472_s20 = sld [smem:[#allocation27_spill]]  ;;  %s3482_s16 = smov %s1903_s17 }
 0x1a7   : > { %s3473_s4 = sld [smem:[#allocation23_spill]] }
 0x1a8   : > { %s3474_s22 = sld [smem:[#allocation24_spill]]  ;;  %s3478_s12 = smov %s3468_s11 }
 0x1a9   : > { %s3475_s23 = sld [smem:[#allocation25_spill]]  ;;  %s3480_s14 = smov %s3469_s18 }
 0x1aa   : > { %s3476_s24 = sld [smem:[#allocation26_spill]]  ;;  %s3483_s17 = smov %s3470_s21 }
 0x1ab   : > { %s3484_s18 = smov %s1911_s19  ;;  %s3485_s19 = smov %s3471_s8 }
 0x1ac   :  { %21 = sbr.rel (!%p3286_p13) target bundleno = 15 (0xf), region = 130 }
 0x1ad   : > { %s3486_s21 = smov %s3473_s4 }
 0x1b1   :  { %1301 = vsyncpa [#allocation3], 1 }
 0x1b2   :  { %1303 = vsyncpa [#allocation3 + $0x1], 1 }
 0x1b3   :  { %1304 = vsyncpa [#allocation6], 1 }
 0x1b4   :  { %1306 = vsyncpa [#allocation6 + $0x1], 1 }
 0x1b5   :  { %1307 = vsyncpa [#allocation4], 1 }
 0x1b6   :  { %1309 = vsyncpa [#allocation4 + $0x1], 1 }

</bundles_post_ra>
